<compile_context>
chip_gen: v5e
topology: v5e:2x2
jax: 0.10.0
libtpu: 0.0.40
codegen_flags: <defaults>
</compile_context>

<pallas_src>
import functools

import jax
import jax.numpy as jnp
from jax.experimental import pallas as pl
from jax.experimental.pallas import tpu as pltpu


def _sac_policy_lstm_kernel(
    # flattened per-timestep inputs (T*Bp, .)
    state_ref, act_ref,
    # initial hidden state (Bp, H)
    h0_ref, c0_ref,
    # fused linear1 | linear2(state part): (D, 2H), (1, 2H); linear2 action part (A, H)
    w12_ref, b12_ref, w2a_ref,
    # LSTM weights, gates fused along lanes (i|f|g|o): (H, 4H), (H, 4H), (1, 4H)
    wih_ref, whh_ref, bg_ref,
    # linear3 split (fc branch / lstm branch) and bias
    w3f_ref, w3l_ref, b3_ref,
    # linear4
    w4_ref, b4_ref,
    # fused mean|log_std head: (H, 2A), (1, 2A)
    wh_ref, bh_ref,
    # outputs
    out_ref, hout_ref, cout_ref,
    *, T, Bp, H, A, log_std_min, log_std_max,
):
    f32 = jnp.float32
    x = state_ref[...]      # (T*Bp, D)
    a = act_ref[...]        # (T*Bp, A)

    # ---- hoisted, batched over all timesteps (off the serial critical path) ----
    pre12 = jnp.dot(x, w12_ref[...], preferred_element_type=f32) + b12_ref[...]
    fc_all = jnp.maximum(pre12[:, :H], 0.0)                       # relu(linear1(state))
    lstm_in_all = jnp.maximum(                                    # relu(linear2(cat(state, act)))
        pre12[:, H:] + jnp.dot(a, w2a_ref[...], preferred_element_type=f32), 0.0)
    # input->gate product for all timesteps, gates fused to 4H lanes
    xg_all = jnp.dot(lstm_in_all, wih_ref[...], preferred_element_type=f32) + bg_ref[...]

    # ---- serial LSTM recurrence: one (Bp,H)@(H,4H) matmul + elementwise per step ----
    whh = whh_ref[...]
    h = h0_ref[...]
    c = c0_ref[...]
    hs = []
    # T is small and static; the python loop unrolls at trace time so all row/lane
    # slices below are compile-time-constant (sublane-aligned) slices.
    for t in range(T):
        xg = xg_all[t * Bp:(t + 1) * Bp, :]
        gates = xg + jnp.dot(h, whh, preferred_element_type=f32)   # (Bp, 4H)
        i_g = jax.nn.sigmoid(gates[:, 0 * H:1 * H])
        f_g = jax.nn.sigmoid(gates[:, 1 * H:2 * H])
        g_g = jnp.tanh(gates[:, 2 * H:3 * H])
        o_g = jax.nn.sigmoid(gates[:, 3 * H:4 * H])
        c = f_g * c + i_g * g_g
        h = o_g * jnp.tanh(c)
        hs.append(h)
    hs_all = jnp.concatenate(hs, axis=0)   # (T*Bp, H)

    # ---- post-loop batched head path ----
    merged = jnp.maximum(
        jnp.dot(fc_all, w3f_ref[...], preferred_element_type=f32)
        + jnp.dot(hs_all, w3l_ref[...], preferred_element_type=f32)
        + b3_ref[...], 0.0)
    x4 = jnp.maximum(
        jnp.dot(merged, w4_ref[...], preferred_element_type=f32) + b4_ref[...], 0.0)
    heads = jnp.dot(x4, wh_ref[...], preferred_element_type=f32) + bh_ref[...]   # (T*Bp, 2A)
    # clamp only the log_std half of the packed output
    lane = jax.lax.broadcasted_iota(jnp.int32, heads.shape, 1)
    heads = jnp.where(lane < A, heads, jnp.clip(heads, log_std_min, log_std_max))

    out_ref[...] = heads
    hout_ref[...] = h
    cout_ref[...] = c


def init_params(key, state_dim, action_dim, hidden_size, init_w=0.003):
    """Deterministic PyTorch-style init (uniform +-1/sqrt(fan_in))."""
    ks = jax.random.split(key, 16)

    def lin(kw, kb, out_f, in_f, bound=None):
        b = bound if bound is not None else 1.0 / jnp.sqrt(in_f)
        w = jax.random.uniform(kw, (out_f, in_f), jnp.float32, -b, b)
        bias = jax.random.uniform(kb, (out_f,), jnp.float32, -b, b)
        return w, bias

    H = hidden_size
    p = {}
    p["w1"], p["b1"] = lin(ks[0], ks[1], H, state_dim)
    p["w2"], p["b2"] = lin(ks[2], ks[3], H, state_dim + action_dim)
    lb = 1.0 / jnp.sqrt(H)
    p["w_ih"] = jax.random.uniform(ks[4], (4 * H, H), jnp.float32, -lb, lb)
    p["w_hh"] = jax.random.uniform(ks[5], (4 * H, H), jnp.float32, -lb, lb)
    p["b_ih"] = jax.random.uniform(ks[6], (4 * H,), jnp.float32, -lb, lb)
    p["b_hh"] = jax.random.uniform(ks[7], (4 * H,), jnp.float32, -lb, lb)
    p["w3"], p["b3"] = lin(ks[8], ks[9], H, 2 * H)
    p["w4"], p["b4"] = lin(ks[10], ks[11], H, H)
    p["wm"], p["bm"] = lin(ks[12], ks[13], action_dim, H, bound=init_w)
    p["wls"], p["bls"] = lin(ks[14], ks[15], action_dim, H, bound=init_w)
    return p


def sac_policy_lstm_forward(params, state, last_action, hidden_in,
                            log_std_min=-20.0, log_std_max=2.0):
    """state: (B, T, state_dim), last_action: (B, T, action_dim),
    hidden_in: (h0, c0) each (1, B, hidden).
    Returns mean, log_std (each (B, T, action_dim)) and (h_n, c_n)."""
    B, T, D = state.shape
    A = last_action.shape[-1]
    H = params["w1"].shape[0]
    Bp = max(8, -(-B // 8) * 8)   # pad batch to a sublane multiple (>= 8)

    state_tm = jnp.transpose(state, (1, 0, 2)).astype(jnp.float32)       # (T, B, D)
    act_tm = jnp.transpose(last_action, (1, 0, 2)).astype(jnp.float32)   # (T, B, A)
    pad3 = ((0, 0), (0, Bp - B), (0, 0))
    state_flat = jnp.pad(state_tm, pad3).reshape(T * Bp, D)
    act_flat = jnp.pad(act_tm, pad3).reshape(T * Bp, A)
    h0 = jnp.pad(hidden_in[0][0].astype(jnp.float32), ((0, Bp - B), (0, 0)))
    c0 = jnp.pad(hidden_in[1][0].astype(jnp.float32), ((0, Bp - B), (0, 0)))

    def tw(w):  # (out, in) -> (in, out)
        return jnp.transpose(w)

    def tb(b):
        return b.reshape(1, -1)

    # fused linear1 | linear2(state-part): (D, 2H)
    w12 = jnp.concatenate([tw(params["w1"]), tw(params["w2"][:, :D])], axis=1)
    b12 = jnp.concatenate([tb(params["b1"]), tb(params["b2"])], axis=1)
    w2a = tw(params["w2"][:, D:])
    # LSTM weights with gates fused along lanes (PyTorch order i|f|g|o)
    wih = tw(params["w_ih"])
    whh = tw(params["w_hh"])
    bg = tb(params["b_ih"] + params["b_hh"])
    w3f = tw(params["w3"][:, :H])
    w3l = tw(params["w3"][:, H:])
    b3 = tb(params["b3"])
    w4 = tw(params["w4"])
    b4 = tb(params["b4"])
    # fused mean | log_std head: (H, 2A)
    wh = jnp.concatenate([tw(params["wm"]), tw(params["wls"])], axis=1)
    bh = jnp.concatenate([tb(params["bm"]), tb(params["bls"])], axis=1)

    inputs = (state_flat, act_flat, h0, c0,
              w12, b12, w2a, wih, whh, bg,
              w3f, w3l, b3, w4, b4, wh, bh)

    kernel = functools.partial(
        _sac_policy_lstm_kernel,
        T=T, Bp=Bp, H=H, A=A,
        log_std_min=float(log_std_min), log_std_max=float(log_std_max),
    )

    vmem_spec = pl.BlockSpec(memory_space=pltpu.MemorySpace.VMEM)
    out_pk, h_n, c_n = pl.pallas_call(
        kernel,
        out_shape=(
            jax.ShapeDtypeStruct((T * Bp, 2 * A), jnp.float32),  # packed mean|log_std
            jax.ShapeDtypeStruct((Bp, H), jnp.float32),          # h_n
            jax.ShapeDtypeStruct((Bp, H), jnp.float32),          # c_n
        ),
        in_specs=[vmem_spec] * len(inputs),
        out_specs=(vmem_spec, vmem_spec, vmem_spec),
    )(*inputs)

    out3 = out_pk.reshape(T, Bp, 2 * A)[:, :B, :]
    mean = jnp.transpose(out3[..., :A], (1, 0, 2))       # (B, T, A)
    log_std = jnp.transpose(out3[..., A:], (1, 0, 2))    # (B, T, A)
    hidden_out = (h_n[:B][None], c_n[:B][None])          # each (1, B, H)
    return mean, log_std, hidden_out


def reference_forward(params, state, last_action, hidden_in,
                      log_std_min=-20.0, log_std_max=2.0):
    """Pure-JAX reference mirroring the PyTorch forward."""
    H = params["w1"].shape[0]
    s = jnp.transpose(state, (1, 0, 2))
    la = jnp.transpose(last_action, (1, 0, 2))
    fc = jax.nn.relu(s @ params["w1"].T + params["b1"])
    lstm_in = jax.nn.relu(
        jnp.concatenate([s, la], -1) @ params["w2"].T + params["b2"])

    def step(carry, xt):
        h, c = carry
        gates = (xt @ params["w_ih"].T + params["b_ih"]
                 + h @ params["w_hh"].T + params["b_hh"])
        i = jax.nn.sigmoid(gates[:, 0:H])
        f = jax.nn.sigmoid(gates[:, H:2 * H])
        g = jnp.tanh(gates[:, 2 * H:3 * H])
        o = jax.nn.sigmoid(gates[:, 3 * H:4 * H])
        c_new = f * c + i * g
        h_new = o * jnp.tanh(c_new)
        return (h_new, c_new), h_new

    (h_n, c_n), hs = jax.lax.scan(step, (hidden_in[0][0], hidden_in[1][0]), lstm_in)
    merged = jnp.concatenate([fc, hs], -1)
    x = jax.nn.relu(merged @ params["w3"].T + params["b3"])
    x = jax.nn.relu(x @ params["w4"].T + params["b4"])
    x = jnp.transpose(x, (1, 0, 2))
    mean = x @ params["wm"].T + params["bm"]
    log_std = jnp.clip(x @ params["wls"].T + params["bls"], log_std_min, log_std_max)
    return mean, log_std, (h_n[None], c_n[None])


if __name__ == "__main__":
    B, T = 2, 8
    STATE_DIM, ACTION_DIM, HIDDEN = 16, 4, 32

    key = jax.random.PRNGKey(0)
    kp, ks, ka, kh, kc = jax.random.split(key, 5)

    params = init_params(kp, STATE_DIM, ACTION_DIM, HIDDEN)
    state = jax.random.normal(ks, (B, T, STATE_DIM), jnp.float32)
    last_action = jax.random.normal(ka, (B, T, ACTION_DIM), jnp.float32)
    h0 = jax.random.normal(kh, (1, B, HIDDEN), jnp.float32) * 0.1
    c0 = jax.random.normal(kc, (1, B, HIDDEN), jnp.float32) * 0.1

    mean, log_std, (h_n, c_n) = sac_policy_lstm_forward(
        params, state, last_action, (h0, c0))
    jax.block_until_ready((mean, log_std, h_n, c_n))

    ref_mean, ref_log_std, (ref_h, ref_c) = reference_forward(
        params, state, last_action, (h0, c0))

    assert mean.shape == (B, T, ACTION_DIM)
    assert log_std.shape == (B, T, ACTION_DIM)
    assert h_n.shape == (1, B, HIDDEN) and c_n.shape == (1, B, HIDDEN)
    assert jnp.allclose(mean, ref_mean, rtol=1e-4, atol=1e-5)
    assert jnp.allclose(log_std, ref_log_std, rtol=1e-4, atol=1e-5)
    assert jnp.allclose(h_n, ref_h, rtol=1e-4, atol=1e-5)
    assert jnp.allclose(c_n, ref_c, rtol=1e-4, atol=1e-5)

    print("KERNEL_OK")
</pallas_src>

<mosaic_0001>
module attributes {stable_mosaic.version = 11 : i64} {
  func.func @_sac_policy_lstm_kernel(%arg0: memref<64x16xf32, #tpu.memory_space<vmem>>, %arg1: memref<64x4xf32, #tpu.memory_space<vmem>>, %arg2: memref<8x32xf32, #tpu.memory_space<vmem>>, %arg3: memref<8x32xf32, #tpu.memory_space<vmem>>, %arg4: memref<16x64xf32, #tpu.memory_space<vmem>>, %arg5: memref<1x64xf32, #tpu.memory_space<vmem>>, %arg6: memref<4x32xf32, #tpu.memory_space<vmem>>, %arg7: memref<32x128xf32, #tpu.memory_space<vmem>>, %arg8: memref<32x128xf32, #tpu.memory_space<vmem>>, %arg9: memref<1x128xf32, #tpu.memory_space<vmem>>, %arg10: memref<32x32xf32, #tpu.memory_space<vmem>>, %arg11: memref<32x32xf32, #tpu.memory_space<vmem>>, %arg12: memref<1x32xf32, #tpu.memory_space<vmem>>, %arg13: memref<32x32xf32, #tpu.memory_space<vmem>>, %arg14: memref<1x32xf32, #tpu.memory_space<vmem>>, %arg15: memref<32x8xf32, #tpu.memory_space<vmem>>, %arg16: memref<1x8xf32, #tpu.memory_space<vmem>>, %arg17: memref<64x8xf32, #tpu.memory_space<vmem>>, %arg18: memref<8x32xf32, #tpu.memory_space<vmem>>, %arg19: memref<8x32xf32, #tpu.memory_space<vmem>>) attributes {dimension_semantics = [], scalar_prefetch = 0 : i64, scratch_operands = 0 : i64, tpu.core_type = #tpu.core_type<tc>} {
    %c0 = arith.constant 0 : index
    %c0_0 = arith.constant 0 : index
    %0 = vector.load %arg0[%c0, %c0_0] : memref<64x16xf32, #tpu.memory_space<vmem>>, vector<64x16xf32>
    %c0_1 = arith.constant 0 : index
    %c0_2 = arith.constant 0 : index
    %1 = vector.load %arg1[%c0_1, %c0_2] : memref<64x4xf32, #tpu.memory_space<vmem>>, vector<64x4xf32>
    %c0_3 = arith.constant 0 : index
    %c0_4 = arith.constant 0 : index
    %2 = vector.load %arg4[%c0_3, %c0_4] : memref<16x64xf32, #tpu.memory_space<vmem>>, vector<16x64xf32>
    %cst = arith.constant dense<0.000000e+00> : vector<64x64xf32>
    %3 = tpu.matmul %0, %2, %cst {dimension_numbers = #tpu.dot_dimension_numbers<[1], [0], [0], [1], [0, 0, 1, 1], [], []>} : vector<64x16xf32>, vector<16x64xf32>, vector<64x64xf32> -> vector<64x64xf32>
    %c0_5 = arith.constant 0 : index
    %c0_6 = arith.constant 0 : index
    %4 = vector.load %arg5[%c0_5, %c0_6] : memref<1x64xf32, #tpu.memory_space<vmem>>, vector<1x64xf32>
    %5 = vector.broadcast %4 : vector<1x64xf32> to vector<64x64xf32>
    %6 = arith.addf %3, %5 : vector<64x64xf32>
    %7 = vector.extract_strided_slice %6 {offsets = [0, 0], sizes = [64, 32], strides = [1, 1]} : vector<64x64xf32> to vector<64x32xf32>
    %cst_7 = arith.constant 0.000000e+00 : f32
    %8 = vector.broadcast %cst_7 : f32 to vector<64x32xf32>
    %9 = arith.maximumf %7, %8 : vector<64x32xf32>
    %10 = vector.extract_strided_slice %6 {offsets = [0, 32], sizes = [64, 32], strides = [1, 1]} : vector<64x64xf32> to vector<64x32xf32>
    %c0_8 = arith.constant 0 : index
    %c0_9 = arith.constant 0 : index
    %11 = vector.load %arg6[%c0_8, %c0_9] : memref<4x32xf32, #tpu.memory_space<vmem>>, vector<4x32xf32>
    %cst_10 = arith.constant dense<0.000000e+00> : vector<64x32xf32>
    %12 = tpu.matmul %1, %11, %cst_10 {dimension_numbers = #tpu.dot_dimension_numbers<[1], [0], [0], [1], [0, 0, 1, 1], [], []>} : vector<64x4xf32>, vector<4x32xf32>, vector<64x32xf32> -> vector<64x32xf32>
    %13 = arith.addf %10, %12 : vector<64x32xf32>
    %cst_11 = arith.constant 0.000000e+00 : f32
    %14 = vector.broadcast %cst_11 : f32 to vector<64x32xf32>
    %15 = arith.maximumf %13, %14 : vector<64x32xf32>
    %c0_12 = arith.constant 0 : index
    %c0_13 = arith.constant 0 : index
    %16 = vector.load %arg7[%c0_12, %c0_13] : memref<32x128xf32, #tpu.memory_space<vmem>>, vector<32x128xf32>
    %cst_14 = arith.constant dense<0.000000e+00> : vector<64x128xf32>
    %17 = tpu.matmul %15, %16, %cst_14 {dimension_numbers = #tpu.dot_dimension_numbers<[1], [0], [0], [1], [0, 0, 1, 1], [], []>} : vector<64x32xf32>, vector<32x128xf32>, vector<64x128xf32> -> vector<64x128xf32>
    %c0_15 = arith.constant 0 : index
    %c0_16 = arith.constant 0 : index
    %18 = vector.load %arg9[%c0_15, %c0_16] : memref<1x128xf32, #tpu.memory_space<vmem>>, vector<1x128xf32>
    %19 = vector.broadcast %18 : vector<1x128xf32> to vector<64x128xf32>
    %20 = arith.addf %17, %19 : vector<64x128xf32>
    %c0_17 = arith.constant 0 : index
    %c0_18 = arith.constant 0 : index
    %21 = vector.load %arg8[%c0_17, %c0_18] : memref<32x128xf32, #tpu.memory_space<vmem>>, vector<32x128xf32>
    %c0_19 = arith.constant 0 : index
    %c0_20 = arith.constant 0 : index
    %22 = vector.load %arg2[%c0_19, %c0_20] : memref<8x32xf32, #tpu.memory_space<vmem>>, vector<8x32xf32>
    %c0_21 = arith.constant 0 : index
    %c0_22 = arith.constant 0 : index
    %23 = vector.load %arg3[%c0_21, %c0_22] : memref<8x32xf32, #tpu.memory_space<vmem>>, vector<8x32xf32>
    %24 = vector.extract_strided_slice %20 {offsets = [0, 0], sizes = [8, 128], strides = [1, 1]} : vector<64x128xf32> to vector<8x128xf32>
    %cst_23 = arith.constant dense<0.000000e+00> : vector<8x128xf32>
    %25 = tpu.matmul %22, %21, %cst_23 {dimension_numbers = #tpu.dot_dimension_numbers<[1], [0], [0], [1], [0, 0, 1, 1], [], []>} : vector<8x32xf32>, vector<32x128xf32>, vector<8x128xf32> -> vector<8x128xf32>
    %26 = arith.addf %24, %25 : vector<8x128xf32>
    %27 = vector.extract_strided_slice %26 {offsets = [0, 0], sizes = [8, 32], strides = [1, 1]} : vector<8x128xf32> to vector<8x32xf32>
    %28 = arith.negf %27 : vector<8x32xf32>
    %29 = math.exp %28 : vector<8x32xf32>
    %cst_24 = arith.constant 1.000000e+00 : f32
    %30 = vector.broadcast %cst_24 : f32 to vector<8x32xf32>
    %31 = arith.addf %30, %29 : vector<8x32xf32>
    %32 = arith.divf %30, %31 : vector<8x32xf32>
    %33 = vector.extract_strided_slice %26 {offsets = [0, 32], sizes = [8, 32], strides = [1, 1]} : vector<8x128xf32> to vector<8x32xf32>
    %34 = arith.negf %33 : vector<8x32xf32>
    %35 = math.exp %34 : vector<8x32xf32>
    %cst_25 = arith.constant 1.000000e+00 : f32
    %36 = vector.broadcast %cst_25 : f32 to vector<8x32xf32>
    %37 = arith.addf %36, %35 : vector<8x32xf32>
    %38 = arith.divf %36, %37 : vector<8x32xf32>
    %39 = vector.extract_strided_slice %26 {offsets = [0, 64], sizes = [8, 32], strides = [1, 1]} : vector<8x128xf32> to vector<8x32xf32>
    %40 = math.tanh %39 : vector<8x32xf32>
    %41 = vector.extract_strided_slice %26 {offsets = [0, 96], sizes = [8, 32], strides = [1, 1]} : vector<8x128xf32> to vector<8x32xf32>
    %42 = arith.negf %41 : vector<8x32xf32>
    %43 = math.exp %42 : vector<8x32xf32>
    %cst_26 = arith.constant 1.000000e+00 : f32
    %44 = vector.broadcast %cst_26 : f32 to vector<8x32xf32>
    %45 = arith.addf %44, %43 : vector<8x32xf32>
    %46 = arith.divf %44, %45 : vector<8x32xf32>
    %47 = arith.mulf %38, %23 : vector<8x32xf32>
    %48 = arith.mulf %32, %40 : vector<8x32xf32>
    %49 = arith.addf %47, %48 : vector<8x32xf32>
    %50 = math.tanh %49 : vector<8x32xf32>
    %51 = arith.mulf %46, %50 : vector<8x32xf32>
    %52 = vector.extract_strided_slice %20 {offsets = [8, 0], sizes = [8, 128], strides = [1, 1]} : vector<64x128xf32> to vector<8x128xf32>
    %cst_27 = arith.constant dense<0.000000e+00> : vector<8x128xf32>
    %53 = tpu.matmul %51, %21, %cst_27 {dimension_numbers = #tpu.dot_dimension_numbers<[1], [0], [0], [1], [0, 0, 1, 1], [], []>} : vector<8x32xf32>, vector<32x128xf32>, vector<8x128xf32> -> vector<8x128xf32>
    %54 = arith.addf %52, %53 : vector<8x128xf32>
    %55 = vector.extract_strided_slice %54 {offsets = [0, 0], sizes = [8, 32], strides = [1, 1]} : vector<8x128xf32> to vector<8x32xf32>
    %56 = arith.negf %55 : vector<8x32xf32>
    %57 = math.exp %56 : vector<8x32xf32>
    %cst_28 = arith.constant 1.000000e+00 : f32
    %58 = vector.broadcast %cst_28 : f32 to vector<8x32xf32>
    %59 = arith.addf %58, %57 : vector<8x32xf32>
    %60 = arith.divf %58, %59 : vector<8x32xf32>
    %61 = vector.extract_strided_slice %54 {offsets = [0, 32], sizes = [8, 32], strides = [1, 1]} : vector<8x128xf32> to vector<8x32xf32>
    %62 = arith.negf %61 : vector<8x32xf32>
    %63 = math.exp %62 : vector<8x32xf32>
    %cst_29 = arith.constant 1.000000e+00 : f32
    %64 = vector.broadcast %cst_29 : f32 to vector<8x32xf32>
    %65 = arith.addf %64, %63 : vector<8x32xf32>
    %66 = arith.divf %64, %65 : vector<8x32xf32>
    %67 = vector.extract_strided_slice %54 {offsets = [0, 64], sizes = [8, 32], strides = [1, 1]} : vector<8x128xf32> to vector<8x32xf32>
    %68 = math.tanh %67 : vector<8x32xf32>
    %69 = vector.extract_strided_slice %54 {offsets = [0, 96], sizes = [8, 32], strides = [1, 1]} : vector<8x128xf32> to vector<8x32xf32>
    %70 = arith.negf %69 : vector<8x32xf32>
    %71 = math.exp %70 : vector<8x32xf32>
    %cst_30 = arith.constant 1.000000e+00 : f32
    %72 = vector.broadcast %cst_30 : f32 to vector<8x32xf32>
    %73 = arith.addf %72, %71 : vector<8x32xf32>
    %74 = arith.divf %72, %73 : vector<8x32xf32>
    %75 = arith.mulf %66, %49 : vector<8x32xf32>
    %76 = arith.mulf %60, %68 : vector<8x32xf32>
    %77 = arith.addf %75, %76 : vector<8x32xf32>
    %78 = math.tanh %77 : vector<8x32xf32>
    %79 = arith.mulf %74, %78 : vector<8x32xf32>
    %80 = vector.extract_strided_slice %20 {offsets = [16, 0], sizes = [8, 128], strides = [1, 1]} : vector<64x128xf32> to vector<8x128xf32>
    %cst_31 = arith.constant dense<0.000000e+00> : vector<8x128xf32>
    %81 = tpu.matmul %79, %21, %cst_31 {dimension_numbers = #tpu.dot_dimension_numbers<[1], [0], [0], [1], [0, 0, 1, 1], [], []>} : vector<8x32xf32>, vector<32x128xf32>, vector<8x128xf32> -> vector<8x128xf32>
    %82 = arith.addf %80, %81 : vector<8x128xf32>
    %83 = vector.extract_strided_slice %82 {offsets = [0, 0], sizes = [8, 32], strides = [1, 1]} : vector<8x128xf32> to vector<8x32xf32>
    %84 = arith.negf %83 : vector<8x32xf32>
    %85 = math.exp %84 : vector<8x32xf32>
    %cst_32 = arith.constant 1.000000e+00 : f32
    %86 = vector.broadcast %cst_32 : f32 to vector<8x32xf32>
    %87 = arith.addf %86, %85 : vector<8x32xf32>
    %88 = arith.divf %86, %87 : vector<8x32xf32>
    %89 = vector.extract_strided_slice %82 {offsets = [0, 32], sizes = [8, 32], strides = [1, 1]} : vector<8x128xf32> to vector<8x32xf32>
    %90 = arith.negf %89 : vector<8x32xf32>
    %91 = math.exp %90 : vector<8x32xf32>
    %cst_33 = arith.constant 1.000000e+00 : f32
    %92 = vector.broadcast %cst_33 : f32 to vector<8x32xf32>
    %93 = arith.addf %92, %91 : vector<8x32xf32>
    %94 = arith.divf %92, %93 : vector<8x32xf32>
    %95 = vector.extract_strided_slice %82 {offsets = [0, 64], sizes = [8, 32], strides = [1, 1]} : vector<8x128xf32> to vector<8x32xf32>
    %96 = math.tanh %95 : vector<8x32xf32>
    %97 = vector.extract_strided_slice %82 {offsets = [0, 96], sizes = [8, 32], strides = [1, 1]} : vector<8x128xf32> to vector<8x32xf32>
    %98 = arith.negf %97 : vector<8x32xf32>
    %99 = math.exp %98 : vector<8x32xf32>
    %cst_34 = arith.constant 1.000000e+00 : f32
    %100 = vector.broadcast %cst_34 : f32 to vector<8x32xf32>
    %101 = arith.addf %100, %99 : vector<8x32xf32>
    %102 = arith.divf %100, %101 : vector<8x32xf32>
    %103 = arith.mulf %94, %77 : vector<8x32xf32>
    %104 = arith.mulf %88, %96 : vector<8x32xf32>
    %105 = arith.addf %103, %104 : vector<8x32xf32>
    %106 = math.tanh %105 : vector<8x32xf32>
    %107 = arith.mulf %102, %106 : vector<8x32xf32>
    %108 = vector.extract_strided_slice %20 {offsets = [24, 0], sizes = [8, 128], strides = [1, 1]} : vector<64x128xf32> to vector<8x128xf32>
    %cst_35 = arith.constant dense<0.000000e+00> : vector<8x128xf32>
    %109 = tpu.matmul %107, %21, %cst_35 {dimension_numbers = #tpu.dot_dimension_numbers<[1], [0], [0], [1], [0, 0, 1, 1], [], []>} : vector<8x32xf32>, vector<32x128xf32>, vector<8x128xf32> -> vector<8x128xf32>
    %110 = arith.addf %108, %109 : vector<8x128xf32>
    %111 = vector.extract_strided_slice %110 {offsets = [0, 0], sizes = [8, 32], strides = [1, 1]} : vector<8x128xf32> to vector<8x32xf32>
    %112 = arith.negf %111 : vector<8x32xf32>
    %113 = math.exp %112 : vector<8x32xf32>
    %cst_36 = arith.constant 1.000000e+00 : f32
    %114 = vector.broadcast %cst_36 : f32 to vector<8x32xf32>
    %115 = arith.addf %114, %113 : vector<8x32xf32>
    %116 = arith.divf %114, %115 : vector<8x32xf32>
    %117 = vector.extract_strided_slice %110 {offsets = [0, 32], sizes = [8, 32], strides = [1, 1]} : vector<8x128xf32> to vector<8x32xf32>
    %118 = arith.negf %117 : vector<8x32xf32>
    %119 = math.exp %118 : vector<8x32xf32>
    %cst_37 = arith.constant 1.000000e+00 : f32
    %120 = vector.broadcast %cst_37 : f32 to vector<8x32xf32>
    %121 = arith.addf %120, %119 : vector<8x32xf32>
    %122 = arith.divf %120, %121 : vector<8x32xf32>
    %123 = vector.extract_strided_slice %110 {offsets = [0, 64], sizes = [8, 32], strides = [1, 1]} : vector<8x128xf32> to vector<8x32xf32>
    %124 = math.tanh %123 : vector<8x32xf32>
    %125 = vector.extract_strided_slice %110 {offsets = [0, 96], sizes = [8, 32], strides = [1, 1]} : vector<8x128xf32> to vector<8x32xf32>
    %126 = arith.negf %125 : vector<8x32xf32>
    %127 = math.exp %126 : vector<8x32xf32>
    %cst_38 = arith.constant 1.000000e+00 : f32
    %128 = vector.broadcast %cst_38 : f32 to vector<8x32xf32>
    %129 = arith.addf %128, %127 : vector<8x32xf32>
    %130 = arith.divf %128, %129 : vector<8x32xf32>
    %131 = arith.mulf %122, %105 : vector<8x32xf32>
    %132 = arith.mulf %116, %124 : vector<8x32xf32>
    %133 = arith.addf %131, %132 : vector<8x32xf32>
    %134 = math.tanh %133 : vector<8x32xf32>
    %135 = arith.mulf %130, %134 : vector<8x32xf32>
    %136 = vector.extract_strided_slice %20 {offsets = [32, 0], sizes = [8, 128], strides = [1, 1]} : vector<64x128xf32> to vector<8x128xf32>
    %cst_39 = arith.constant dense<0.000000e+00> : vector<8x128xf32>
    %137 = tpu.matmul %135, %21, %cst_39 {dimension_numbers = #tpu.dot_dimension_numbers<[1], [0], [0], [1], [0, 0, 1, 1], [], []>} : vector<8x32xf32>, vector<32x128xf32>, vector<8x128xf32> -> vector<8x128xf32>
    %138 = arith.addf %136, %137 : vector<8x128xf32>
    %139 = vector.extract_strided_slice %138 {offsets = [0, 0], sizes = [8, 32], strides = [1, 1]} : vector<8x128xf32> to vector<8x32xf32>
    %140 = arith.negf %139 : vector<8x32xf32>
    %141 = math.exp %140 : vector<8x32xf32>
    %cst_40 = arith.constant 1.000000e+00 : f32
    %142 = vector.broadcast %cst_40 : f32 to vector<8x32xf32>
    %143 = arith.addf %142, %141 : vector<8x32xf32>
    %144 = arith.divf %142, %143 : vector<8x32xf32>
    %145 = vector.extract_strided_slice %138 {offsets = [0, 32], sizes = [8, 32], strides = [1, 1]} : vector<8x128xf32> to vector<8x32xf32>
    %146 = arith.negf %145 : vector<8x32xf32>
    %147 = math.exp %146 : vector<8x32xf32>
    %cst_41 = arith.constant 1.000000e+00 : f32
    %148 = vector.broadcast %cst_41 : f32 to vector<8x32xf32>
    %149 = arith.addf %148, %147 : vector<8x32xf32>
    %150 = arith.divf %148, %149 : vector<8x32xf32>
    %151 = vector.extract_strided_slice %138 {offsets = [0, 64], sizes = [8, 32], strides = [1, 1]} : vector<8x128xf32> to vector<8x32xf32>
    %152 = math.tanh %151 : vector<8x32xf32>
    %153 = vector.extract_strided_slice %138 {offsets = [0, 96], sizes = [8, 32], strides = [1, 1]} : vector<8x128xf32> to vector<8x32xf32>
    %154 = arith.negf %153 : vector<8x32xf32>
    %155 = math.exp %154 : vector<8x32xf32>
    %cst_42 = arith.constant 1.000000e+00 : f32
    %156 = vector.broadcast %cst_42 : f32 to vector<8x32xf32>
    %157 = arith.addf %156, %155 : vector<8x32xf32>
    %158 = arith.divf %156, %157 : vector<8x32xf32>
    %159 = arith.mulf %150, %133 : vector<8x32xf32>
    %160 = arith.mulf %144, %152 : vector<8x32xf32>
    %161 = arith.addf %159, %160 : vector<8x32xf32>
    %162 = math.tanh %161 : vector<8x32xf32>
    %163 = arith.mulf %158, %162 : vector<8x32xf32>
    %164 = vector.extract_strided_slice %20 {offsets = [40, 0], sizes = [8, 128], strides = [1, 1]} : vector<64x128xf32> to vector<8x128xf32>
    %cst_43 = arith.constant dense<0.000000e+00> : vector<8x128xf32>
    %165 = tpu.matmul %163, %21, %cst_43 {dimension_numbers = #tpu.dot_dimension_numbers<[1], [0], [0], [1], [0, 0, 1, 1], [], []>} : vector<8x32xf32>, vector<32x128xf32>, vector<8x128xf32> -> vector<8x128xf32>
    %166 = arith.addf %164, %165 : vector<8x128xf32>
    %167 = vector.extract_strided_slice %166 {offsets = [0, 0], sizes = [8, 32], strides = [1, 1]} : vector<8x128xf32> to vector<8x32xf32>
    %168 = arith.negf %167 : vector<8x32xf32>
    %169 = math.exp %168 : vector<8x32xf32>
    %cst_44 = arith.constant 1.000000e+00 : f32
    %170 = vector.broadcast %cst_44 : f32 to vector<8x32xf32>
    %171 = arith.addf %170, %169 : vector<8x32xf32>
    %172 = arith.divf %170, %171 : vector<8x32xf32>
    %173 = vector.extract_strided_slice %166 {offsets = [0, 32], sizes = [8, 32], strides = [1, 1]} : vector<8x128xf32> to vector<8x32xf32>
    %174 = arith.negf %173 : vector<8x32xf32>
    %175 = math.exp %174 : vector<8x32xf32>
    %cst_45 = arith.constant 1.000000e+00 : f32
    %176 = vector.broadcast %cst_45 : f32 to vector<8x32xf32>
    %177 = arith.addf %176, %175 : vector<8x32xf32>
    %178 = arith.divf %176, %177 : vector<8x32xf32>
    %179 = vector.extract_strided_slice %166 {offsets = [0, 64], sizes = [8, 32], strides = [1, 1]} : vector<8x128xf32> to vector<8x32xf32>
    %180 = math.tanh %179 : vector<8x32xf32>
    %181 = vector.extract_strided_slice %166 {offsets = [0, 96], sizes = [8, 32], strides = [1, 1]} : vector<8x128xf32> to vector<8x32xf32>
    %182 = arith.negf %181 : vector<8x32xf32>
    %183 = math.exp %182 : vector<8x32xf32>
    %cst_46 = arith.constant 1.000000e+00 : f32
    %184 = vector.broadcast %cst_46 : f32 to vector<8x32xf32>
    %185 = arith.addf %184, %183 : vector<8x32xf32>
    %186 = arith.divf %184, %185 : vector<8x32xf32>
    %187 = arith.mulf %178, %161 : vector<8x32xf32>
    %188 = arith.mulf %172, %180 : vector<8x32xf32>
    %189 = arith.addf %187, %188 : vector<8x32xf32>
    %190 = math.tanh %189 : vector<8x32xf32>
    %191 = arith.mulf %186, %190 : vector<8x32xf32>
    %192 = vector.extract_strided_slice %20 {offsets = [48, 0], sizes = [8, 128], strides = [1, 1]} : vector<64x128xf32> to vector<8x128xf32>
    %cst_47 = arith.constant dense<0.000000e+00> : vector<8x128xf32>
    %193 = tpu.matmul %191, %21, %cst_47 {dimension_numbers = #tpu.dot_dimension_numbers<[1], [0], [0], [1], [0, 0, 1, 1], [], []>} : vector<8x32xf32>, vector<32x128xf32>, vector<8x128xf32> -> vector<8x128xf32>
    %194 = arith.addf %192, %193 : vector<8x128xf32>
    %195 = vector.extract_strided_slice %194 {offsets = [0, 0], sizes = [8, 32], strides = [1, 1]} : vector<8x128xf32> to vector<8x32xf32>
    %196 = arith.negf %195 : vector<8x32xf32>
    %197 = math.exp %196 : vector<8x32xf32>
    %cst_48 = arith.constant 1.000000e+00 : f32
    %198 = vector.broadcast %cst_48 : f32 to vector<8x32xf32>
    %199 = arith.addf %198, %197 : vector<8x32xf32>
    %200 = arith.divf %198, %199 : vector<8x32xf32>
    %201 = vector.extract_strided_slice %194 {offsets = [0, 32], sizes = [8, 32], strides = [1, 1]} : vector<8x128xf32> to vector<8x32xf32>
    %202 = arith.negf %201 : vector<8x32xf32>
    %203 = math.exp %202 : vector<8x32xf32>
    %cst_49 = arith.constant 1.000000e+00 : f32
    %204 = vector.broadcast %cst_49 : f32 to vector<8x32xf32>
    %205 = arith.addf %204, %203 : vector<8x32xf32>
    %206 = arith.divf %204, %205 : vector<8x32xf32>
    %207 = vector.extract_strided_slice %194 {offsets = [0, 64], sizes = [8, 32], strides = [1, 1]} : vector<8x128xf32> to vector<8x32xf32>
    %208 = math.tanh %207 : vector<8x32xf32>
    %209 = vector.extract_strided_slice %194 {offsets = [0, 96], sizes = [8, 32], strides = [1, 1]} : vector<8x128xf32> to vector<8x32xf32>
    %210 = arith.negf %209 : vector<8x32xf32>
    %211 = math.exp %210 : vector<8x32xf32>
    %cst_50 = arith.constant 1.000000e+00 : f32
    %212 = vector.broadcast %cst_50 : f32 to vector<8x32xf32>
    %213 = arith.addf %212, %211 : vector<8x32xf32>
    %214 = arith.divf %212, %213 : vector<8x32xf32>
    %215 = arith.mulf %206, %189 : vector<8x32xf32>
    %216 = arith.mulf %200, %208 : vector<8x32xf32>
    %217 = arith.addf %215, %216 : vector<8x32xf32>
    %218 = math.tanh %217 : vector<8x32xf32>
    %219 = arith.mulf %214, %218 : vector<8x32xf32>
    %220 = vector.extract_strided_slice %20 {offsets = [56, 0], sizes = [8, 128], strides = [1, 1]} : vector<64x128xf32> to vector<8x128xf32>
    %cst_51 = arith.constant dense<0.000000e+00> : vector<8x128xf32>
    %221 = tpu.matmul %219, %21, %cst_51 {dimension_numbers = #tpu.dot_dimension_numbers<[1], [0], [0], [1], [0, 0, 1, 1], [], []>} : vector<8x32xf32>, vector<32x128xf32>, vector<8x128xf32> -> vector<8x128xf32>
    %222 = arith.addf %220, %221 : vector<8x128xf32>
    %223 = vector.extract_strided_slice %222 {offsets = [0, 0], sizes = [8, 32], strides = [1, 1]} : vector<8x128xf32> to vector<8x32xf32>
    %224 = arith.negf %223 : vector<8x32xf32>
    %225 = math.exp %224 : vector<8x32xf32>
    %cst_52 = arith.constant 1.000000e+00 : f32
    %226 = vector.broadcast %cst_52 : f32 to vector<8x32xf32>
    %227 = arith.addf %226, %225 : vector<8x32xf32>
    %228 = arith.divf %226, %227 : vector<8x32xf32>
    %229 = vector.extract_strided_slice %222 {offsets = [0, 32], sizes = [8, 32], strides = [1, 1]} : vector<8x128xf32> to vector<8x32xf32>
    %230 = arith.negf %229 : vector<8x32xf32>
    %231 = math.exp %230 : vector<8x32xf32>
    %cst_53 = arith.constant 1.000000e+00 : f32
    %232 = vector.broadcast %cst_53 : f32 to vector<8x32xf32>
    %233 = arith.addf %232, %231 : vector<8x32xf32>
    %234 = arith.divf %232, %233 : vector<8x32xf32>
    %235 = vector.extract_strided_slice %222 {offsets = [0, 64], sizes = [8, 32], strides = [1, 1]} : vector<8x128xf32> to vector<8x32xf32>
    %236 = math.tanh %235 : vector<8x32xf32>
    %237 = vector.extract_strided_slice %222 {offsets = [0, 96], sizes = [8, 32], strides = [1, 1]} : vector<8x128xf32> to vector<8x32xf32>
    %238 = arith.negf %237 : vector<8x32xf32>
    %239 = math.exp %238 : vector<8x32xf32>
    %cst_54 = arith.constant 1.000000e+00 : f32
    %240 = vector.broadcast %cst_54 : f32 to vector<8x32xf32>
    %241 = arith.addf %240, %239 : vector<8x32xf32>
    %242 = arith.divf %240, %241 : vector<8x32xf32>
    %243 = arith.mulf %234, %217 : vector<8x32xf32>
    %244 = arith.mulf %228, %236 : vector<8x32xf32>
    %245 = arith.addf %243, %244 : vector<8x32xf32>
    %246 = math.tanh %245 : vector<8x32xf32>
    %247 = arith.mulf %242, %246 : vector<8x32xf32>
    %248 = tpu.concatenate %51, %79, %107, %135, %163, %191, %219, %247 in 0 : vector<8x32xf32>, vector<8x32xf32>, vector<8x32xf32>, vector<8x32xf32>, vector<8x32xf32>, vector<8x32xf32>, vector<8x32xf32>, vector<8x32xf32> -> vector<64x32xf32>
    %c0_55 = arith.constant 0 : index
    %c0_56 = arith.constant 0 : index
    %249 = vector.load %arg10[%c0_55, %c0_56] : memref<32x32xf32, #tpu.memory_space<vmem>>, vector<32x32xf32>
    %cst_57 = arith.constant dense<0.000000e+00> : vector<64x32xf32>
    %250 = tpu.matmul %9, %249, %cst_57 {dimension_numbers = #tpu.dot_dimension_numbers<[1], [0], [0], [1], [0, 0, 1, 1], [], []>} : vector<64x32xf32>, vector<32x32xf32>, vector<64x32xf32> -> vector<64x32xf32>
    %c0_58 = arith.constant 0 : index
    %c0_59 = arith.constant 0 : index
    %251 = vector.load %arg11[%c0_58, %c0_59] : memref<32x32xf32, #tpu.memory_space<vmem>>, vector<32x32xf32>
    %cst_60 = arith.constant dense<0.000000e+00> : vector<64x32xf32>
    %252 = tpu.matmul %248, %251, %cst_60 {dimension_numbers = #tpu.dot_dimension_numbers<[1], [0], [0], [1], [0, 0, 1, 1], [], []>} : vector<64x32xf32>, vector<32x32xf32>, vector<64x32xf32> -> vector<64x32xf32>
    %253 = arith.addf %250, %252 : vector<64x32xf32>
    %c0_61 = arith.constant 0 : index
    %c0_62 = arith.constant 0 : index
    %254 = vector.load %arg12[%c0_61, %c0_62] : memref<1x32xf32, #tpu.memory_space<vmem>>, vector<1x32xf32>
    %255 = vector.broadcast %254 : vector<1x32xf32> to vector<64x32xf32>
    %256 = arith.addf %253, %255 : vector<64x32xf32>
    %cst_63 = arith.constant 0.000000e+00 : f32
    %257 = vector.broadcast %cst_63 : f32 to vector<64x32xf32>
    %258 = arith.maximumf %256, %257 : vector<64x32xf32>
    %c0_64 = arith.constant 0 : index
    %c0_65 = arith.constant 0 : index
    %259 = vector.load %arg13[%c0_64, %c0_65] : memref<32x32xf32, #tpu.memory_space<vmem>>, vector<32x32xf32>
    %cst_66 = arith.constant dense<0.000000e+00> : vector<64x32xf32>
    %260 = tpu.matmul %258, %259, %cst_66 {dimension_numbers = #tpu.dot_dimension_numbers<[1], [0], [0], [1], [0, 0, 1, 1], [], []>} : vector<64x32xf32>, vector<32x32xf32>, vector<64x32xf32> -> vector<64x32xf32>
    %c0_67 = arith.constant 0 : index
    %c0_68 = arith.constant 0 : index
    %261 = vector.load %arg14[%c0_67, %c0_68] : memref<1x32xf32, #tpu.memory_space<vmem>>, vector<1x32xf32>
    %262 = vector.broadcast %261 : vector<1x32xf32> to vector<64x32xf32>
    %263 = arith.addf %260, %262 : vector<64x32xf32>
    %cst_69 = arith.constant 0.000000e+00 : f32
    %264 = vector.broadcast %cst_69 : f32 to vector<64x32xf32>
    %265 = arith.maximumf %263, %264 : vector<64x32xf32>
    %c0_70 = arith.constant 0 : index
    %c0_71 = arith.constant 0 : index
    %266 = vector.load %arg15[%c0_70, %c0_71] : memref<32x8xf32, #tpu.memory_space<vmem>>, vector<32x8xf32>
    %cst_72 = arith.constant dense<0.000000e+00> : vector<64x8xf32>
    %267 = tpu.matmul %265, %266, %cst_72 {dimension_numbers = #tpu.dot_dimension_numbers<[1], [0], [0], [1], [0, 0, 1, 1], [], []>} : vector<64x32xf32>, vector<32x8xf32>, vector<64x8xf32> -> vector<64x8xf32>
    %c0_73 = arith.constant 0 : index
    %c0_74 = arith.constant 0 : index
    %268 = vector.load %arg16[%c0_73, %c0_74] : memref<1x8xf32, #tpu.memory_space<vmem>>, vector<1x8xf32>
    %269 = vector.broadcast %268 : vector<1x8xf32> to vector<64x8xf32>
    %270 = arith.addf %267, %269 : vector<64x8xf32>
    %271 = tpu.iota {dimensions = array<i32: 1>} : vector<64x8xi32>
    %c4_i32 = arith.constant 4 : i32
    %272 = vector.broadcast %c4_i32 : i32 to vector<64x8xi32>
    %273 = arith.cmpi slt, %271, %272 : vector<64x8xi32>
    %cst_75 = arith.constant -2.000000e+01 : f32
    %cst_76 = arith.constant 2.000000e+00 : f32
    %274 = vector.broadcast %cst_75 : f32 to vector<64x8xf32>
    %275 = arith.maximumf %274, %270 : vector<64x8xf32>
    %276 = vector.broadcast %cst_76 : f32 to vector<64x8xf32>
    %277 = arith.minimumf %276, %275 : vector<64x8xf32>
    %278 = arith.select %273, %270, %277 : vector<64x8xi1>, vector<64x8xf32>
    %c0_77 = arith.constant 0 : index
    %c0_78 = arith.constant 0 : index
    %279 = vector.load %arg17[%c0_77, %c0_78] : memref<64x8xf32, #tpu.memory_space<vmem>>, vector<64x8xf32>
    tpu.vector_store %arg17[%c0_77, %c0_78], %278 {strides = array<i32>} : memref<64x8xf32, #tpu.memory_space<vmem>>, vector<64x8xf32>,
    %c0_79 = arith.constant 0 : index
    %c0_80 = arith.constant 0 : index
    %280 = vector.load %arg18[%c0_79, %c0_80] : memref<8x32xf32, #tpu.memory_space<vmem>>, vector<8x32xf32>
    tpu.vector_store %arg18[%c0_79, %c0_80], %247 {strides = array<i32>} : memref<8x32xf32, #tpu.memory_space<vmem>>, vector<8x32xf32>,
    %c0_81 = arith.constant 0 : index
    %c0_82 = arith.constant 0 : index
    %281 = vector.load %arg19[%c0_81, %c0_82] : memref<8x32xf32, #tpu.memory_space<vmem>>, vector<8x32xf32>
    tpu.vector_store %arg19[%c0_81, %c0_82], %245 {strides = array<i32>} : memref<8x32xf32, #tpu.memory_space<vmem>>, vector<8x32xf32>,
    return
  }
}

</mosaic_0001>

<bundles_post_ra>
// kernel: tpu_custom_call.1
= control target key start
LH: loop header
LB: loop body
LE: loop exit
PB: predicated region body
PF: predicated region fallthrough
CT: control target
= control target key end

     0   :  { %s2203_s0 = inlined_call_operand.vmem [shape: f32[64,16], index: 0, kind: input, shape index: {}]   ;;  %s2204_s1 = inlined_call_operand.vmem [shape: f32[64,4], index: 1, kind: input, shape index: {}]   ;;  %s2205_s2 = inlined_call_operand.vmem [shape: f32[8,32], index: 2, kind: input, shape index: {}]   ;;  %s2206_s3 = inlined_call_operand.hbm [shape: f32[8,32], index: 3, kind: input, shape index: {}]   ;;  %s2207_s4 = inlined_call_operand.hbm [shape: f32[16,64], index: 4, kind: input, shape index: {}]   ;;  %s2208_s5 = inlined_call_operand.vmem [shape: f32[1,64], index: 5, kind: input, shape index: {}]   ;;  %s2209_s6 = inlined_call_operand.vmem [shape: f32[4,32], index: 6, kind: input, shape index: {}]   ;;  %s2210_s7 = inlined_call_operand.vmem [shape: f32[32,128], index: 7, kind: input, shape index: {}]   ;;  %s2211_s8 = inlined_call_operand.vmem [shape: f32[32,128], index: 8, kind: input, shape index: {}]   ;;  %s2212_s9 = inlined_call_operand.vmem [shape: f32[1,128], index: 9, kind: input, shape index: {}]   ;;  %s2213_s10 = inlined_call_operand.vmem [shape: f32[32,32], index: 10, kind: input, shape index: {}]   ;;  %s2214_s11 = inlined_call_operand.vmem [shape: f32[32,32], index: 11, kind: input, shape index: {}]   ;;  %s2215_s12 = inlined_call_operand.hbm [shape: f32[1,32], index: 12, kind: input, shape index: {}]   ;;  %s2216_s13 = inlined_call_operand.vmem [shape: f32[32,32], index: 13, kind: input, shape index: {}]   ;;  %s2217_s14 = inlined_call_operand.hbm [shape: f32[1,32], index: 14, kind: input, shape index: {}]   ;;  %s2218_s15 = inlined_call_operand.vmem [shape: f32[32,8], index: 15, kind: input, shape index: {}]   ;;  %s2219_s16 = inlined_call_operand.hbm [shape: f32[1,8], index: 16, kind: input, shape index: {}]   ;;  %s2220_s17 = inlined_call_operand.vmem [shape: f32[64,8], index: 17, kind: output, shape index: {0}]   ;;  %s2221_s18 = inlined_call_operand.hbm [shape: f32[8,32], index: 18, kind: output, shape index: {1}]   ;;  %s2222_s19 = inlined_call_operand.hbm [shape: f32[8,32], index: 19, kind: output, shape index: {2}]  }
   0x1   :  { %2225 = sst [smem:[#allocation19_spill]] %s2203_s0 }
   0x2   :  { %2226 = sst [smem:[#allocation20_spill]] %s2204_s1 }
   0x3   :  { %2227 = sst [smem:[#allocation21_spill]] %s2205_s2 }
   0x4   :  { %2228 = sst [smem:[#allocation22_spill]] %s2206_s3 }
   0x5   :  { %2229 = sst [smem:[#allocation23_spill]] %s2222_s19 }
   0x6   :  { %25 = vsyncpa [#allocation3], 0 }
   0x7   :  { %26 = vsyncpa [#allocation6], 0 }
   0x8   :  { %27 = vsyncpa [#allocation9], 0 }
   0x9   :  { %28 = vsyncpa [#allocation4], 0  ;;  %s51_s20 = sshll.u32 %s2207_s4, 4  ;;  %s52_s20 = int_to_ptr.hbm [resolvable:$true] %s51_s20 }
   0xa   :  { %29 = vsyncpa [#allocation13], 0  ;;  %s1655_s21 = smov [#allocation5]   ;;  %s92_s23 = sshll.u32 %s2217_s14, 4  ;;  %s93_s23 = int_to_ptr.hbm [resolvable:$true] %s92_s23 }
   0xb   :  { %s53_s1 = sshll.u32 %s1655_s21, 4  ;;  %s1656_s24 = smov 128   ;;  %s54_s1 = int_to_ptr.vmem [resolvable:$true] %s53_s1 }
   0xc   :  { %s1657_s25 = smov 8   ;;  %s1658_s3 = smov [#allocation8]  }
   0xd   :  { %59 = dma.hbm_to_vmem [thread:$0]  %s52_s20, 256, %s54_s1, [#allocation6], %s1656_s24, %s1656_s24, %s1657_s25  }
   0xe   :  { %s94_s26 = sshll.u32 %s1658_s3, 4  ;;  %s2230_s29 = sld [smem:[#allocation22_spill]]  ;;  %s95_s26 = int_to_ptr.vmem [resolvable:$true] %s94_s26 }
   0xf   :  { %97 = dma.hbm_to_vmem [thread:$0]  %s93_s23, 16, %s95_s26, [#allocation9]  }
  0x10   :  { %s79_s21 = sshll.u32 %s2215_s12, 4  ;;  %s1659_s19 = smov [#allocation2]   ;;  %s80_s21 = int_to_ptr.hbm [resolvable:$true] %s79_s21 }
  0x11   :  { %s43_s22 = sshll.u32 %s1659_s19, 4  ;;  %s1660_s14 = smov [#allocation7]   ;;  %s44_s22 = int_to_ptr.vmem [resolvable:$true] %s43_s22 }
  0x12   :  { %s81_s20 = sshll.u32 %s1660_s14, 4  ;;  %s105_s24 = sshll.u32 %s2219_s16, 4  ;;  %s82_s20 = int_to_ptr.vmem [resolvable:$true] %s81_s20  ;;  %s106_s24 = int_to_ptr.hbm [resolvable:$true] %s105_s24 }
  0x13   :  { %84 = dma.hbm_to_vmem [thread:$0]  %s80_s21, 16, %s82_s20, [#allocation6]  }
  0x14   :  { %s41_s0 = sshll.u32 %s2230_s29, 4  ;;  %s1661_s25 = smov [#allocation10]   ;;  %s42_s0 = int_to_ptr.hbm [resolvable:$true] %s41_s0 }
  0x15   :  { %46 = dma.hbm_to_vmem [thread:$0]  %s42_s0, 128, %s44_s22, [#allocation3]  }
  0x16   :  { %s107_s23 = sshll.u32 %s1661_s25, 4  ;;  %s108_s23 = int_to_ptr.vmem [resolvable:$true] %s107_s23 }
  0x17   :  { %110 = dma.hbm_to_vmem [thread:$0]  %s106_s24, 16, %s108_s23, [#allocation9]  }
  0x18   :  { %1645 = dma.done.wait [#allocation3], 128  }
  0x19   :  { %1646 = vsyncadd [#allocation3], 4294967168 }
  0x1a   :  { %1647 = dma.done.wait [#allocation6], 272  }
  0x1b   :  { %1648 = vsyncadd [#allocation6], 4294967024 }
  0x1c   :  { %1649 = dma.done.wait [#allocation9], 32  }
  0x1d   :  { %1650 = vsyncadd [#allocation9], 4294967264  ;;  %vm253_vm0 = vcmask 1043456   ;;  %vm228_vm1 = vcmask 31744   ;;  %v227_v0 = vld [vmem:[%s2209_s6] sm:$0xf] }
  0x1e   :  { %s2231_s26 = sld [smem:[#allocation20_spill]]  ;;  %v148_v2 = vld [vmem:[#allocation5 + $0x8] sm:$0xff]  ;;  %1331 = vmatpush.msk.msra.mxu1 %vm253_vm0, %v227_v0  ;;  %v147_v3 = vld [vmem:[#allocation5] sm:$0xff]  ;;  %vm153_vm2 = vcmask 130048   ;;  %v951_v8 = vld [vmem:[%s2213_s10 + $0x18] sm:$0xff]  ;;  %s1662_s3 = smov 32  }
  0x1f   :  { %192 = vmatpush.msra.mxu0 %v148_v2  ;;  %s2232_s29 = sld [smem:[#allocation19_spill]]  ;;  %v950_v9 = vld [vmem:[%s2213_s10 + $0x10] sm:$0xff]  ;;  %v949_v10 = vld [vmem:[%s2213_s10 + $0x8] sm:$0xff]  ;;  %v1408_v16 = vld [vmem:[%s2208_s5] ss:$0 sm:$0xff]  ;;  %vm378_vm3 = vcmask 261120  }
  0x20   :  { %v948_v20 = vld [vmem:[%s2213_s10] sm:$0xff]  ;;  %v349_v27 = vld [vmem:[%s2210_s7 + $0x18] sm:$0xff]  ;;  %v348_v28 = vld [vmem:[%s2210_s7 + $0x10] sm:$0xff]  ;;  %s1663_s28 = smov 96   ;;  %s2233_s30 = sld [smem:[#allocation21_spill]] }
  0x21   :  { %193 = vmatpush.msra.mxu0 %v147_v3  ;;  %v1854_v29 = vld [vmem:[%s2211_s8 + $0x18] sm:$0xff]  ;;  %407 = vmatpush.msra.mxu2 %v349_v27  ;;  %v1860_v30 = vld [vmem:[%s2211_s8 + $0x10] sm:$0xff]  ;;  %v347_v31 = vld [vmem:[%s2210_s7 + $0x8] sm:$0xff]  ;;  %s1293_s10 = sshll.u32 %s2221_s18, 4  ;;  %s1666_s14 = smov [#allocation12]   ;;  %s1294_s10 = int_to_ptr.hbm [resolvable:$true] %s1293_s10 }
  0x22   :  { %457 = vmatpush.msra.mxu3 %v1854_v29  ;;  %v1868_v32 = vld [vmem:[%s2211_s8 + $0x8] sm:$0xff]  ;;  %v346_v33 = vld [vmem:[%s2210_s7] sm:$0xff]  ;;  %v955_v27 = vld [vmem:[%s2214_s11 + $0x18] sm:$0xff]  ;;  %s1302_s20 = sshll.u32 %s1666_s14, 4  ;;  %s2234_s2 = sld [smem:[#allocation23_spill]]  ;;  %s1303_s20 = int_to_ptr.vmem [resolvable:$true] %s1302_s20 }
  0x23   :  { %1038 = vmatpush.msrb.mxu0 %v951_v8  ;;  %408 = vmatpush.msra.mxu2 %v348_v28  ;;  %v1898_v51 = vld [vmem:[%s2211_s8] sm:$0xff]  ;;  %v953_v28 = vld [vmem:[%s2214_s11 + $0x8] sm:$0xff] }
  0x24   :  { %v139_v1 = vld [vmem:[%s2231_s26] sm:$0xff]  ;;  %458 = vmatpush.msra.mxu3 %v1860_v30  ;;  %v140_v55 = vld [vmem:[%s2231_s26 + $0x8] sm:$0xff]  ;;  %973 = vmatpush.msrb.mxu1 %v955_v27 }
  0x25   :  { %v131_v4 = vld [vmem:[%s2232_s29] sm:$0xff]  ;;  %1332 = vmatmul.msk.f32.vlgmr.msra.gmra.mxu1 %vm228_vm1, %v139_v1  ;;  %v132_v5 = vld [vmem:[%s2232_s29 + $0x8] sm:$0xff]  ;;  %v133_v6 = vld [vmem:[%s2232_s29 + $0x10] sm:$0xff]  ;;  %1039 = vmatpush.msrb.mxu0 %v950_v9 }
  0x26   :  { %1323 = vmatmul.msk.f32.vlgmr.msra.gmra.mxu0 %vm153_vm2, %v131_v4  ;;  %v134_v7 = vld [vmem:[%s2232_s29 + $0x18] sm:$0xff]  ;;  %v135_v11 = vld [vmem:[%s2232_s29 + $0x20] sm:$0xff]  ;;  %v136_v12 = vld [vmem:[%s2232_s29 + $0x28] sm:$0xff]  ;;  %409 = vmatpush.msra.mxu2 %v347_v31 }
  0x27   :  { %1040 = vmatpush.msrb.mxu0 %v949_v10  ;;  %v137_v14 = vld [vmem:[%s2232_s29 + $0x30] sm:$0xff]  ;;  %v138_v15 = vld [vmem:[%s2232_s29 + $0x38] sm:$0xff]  ;;  %459 = vmatpush.msra.mxu3 %v1868_v32  ;;  %v440_v52 = vld [vmem:[%s2233_s30] sm:$0xff]  ;;  %s1664_s29 = smov 64  }
  0x28   :  { %410 = vmatpush.msra.mxu2 %v346_v33  ;;  %v1923_v56 = vld [vmem:[%s2212_s9] ss:$0 sm:$0xff]  ;;  %v144_v33 = vld [vmem:[%s2231_s26 + $0x28] sm:$0xff]  ;;  %s1304_s24 = sshll.u32 %s2234_s2, 4  ;;  %s1305_s24 = int_to_ptr.hbm [resolvable:$true] %s1304_s24 }
  0x29   :  { %1041 = vmatpush.msrb.mxu0 %v948_v20  ;;  %460 = vmatpush.msra.mxu3 %v1898_v51  ;;  %v441_v62 = vld [vmem:[#allocation2] sm:$0xff] }
  0x2a   :  { %1348 = vmatmul.msk.f32.vlgmr.msra.gmra.mxu3 %vm378_vm3, %v440_v52  ;;  %v143_v31 = vld [vmem:[%s2231_s26 + $0x20] sm:$0xff] }
  0x2b   :  { %524 = vmatpush.msrb.mxu3 %v1854_v29 }
  0x2d   :  { %525 = vmatpush.msrb.mxu3 %v1860_v30  ;;  %1333 = vmatmul.msk.f32.gmra.mxu1 %vm228_vm1, %v140_v55 }
  0x2e   :  { %1324 = vmatmul.msk.f32.gmra.mxu0 %vm153_vm2, %v132_v5 }
  0x2f   :  { %526 = vmatpush.msrb.mxu3 %v1868_v32 }
  0x31   :  { %527 = vmatpush.msrb.mxu3 %v1898_v51 }
  0x33   :  { %587 = vmatpush.msra.mxu3 %v1854_v29 }
  0x35   :  { %588 = vmatpush.msra.mxu3 %v1860_v30 }
  0x36   :  { %1325 = vmatmul.msk.f32.gmra.mxu0 %vm153_vm2, %v133_v6 }
  0x37   :  { %589 = vmatpush.msra.mxu3 %v1868_v32 }
  0x39   :  { %590 = vmatpush.msra.mxu3 %v1898_v51 }
  0x3e   :  { %1326 = vmatmul.msk.f32.gmra.mxu0 %vm153_vm2, %v134_v7 }
  0x46   :  { %1327 = vmatmul.msk.f32.gmra.mxu0 %vm153_vm2, %v135_v11 }
  0x4e   :  { %1328 = vmatmul.msk.f32.gmra.mxu0 %vm153_vm2, %v136_v12 }
  0x56   :  { %1329 = vmatmul.msk.f32.gmra.mxu0 %vm153_vm2, %v137_v14 }
  0x5e   :  { %1330 = vmatmul.msk.f32.gmra.mxu0 %vm153_vm2, %v138_v15 }
  0xa2   :  { %v274_v13 = vpop.f32.mrf.mxu1 }
  0xa3   :  { %306 = vrot.lane.b32.xlu0 %v274_v13, %s1662_s3  ;;  %v195_v17 = vpop.f32.mrf.mxu0 }
  0xa4   :  { %v196_v18 = vadd.f32 %v1408_v16, %v195_v17 }
  0xa6   :  { %v219_v19 = vmax.f32 %v196_v18, 0.0 }
  0xa8   :  { %1372 = vmatmul.msk.f32.vlgmr.msrb.gmra.mxu0 %vm378_vm3, %v219_v19 }
  0xaa   :  { %v277_v14 = vpop.f32.mrf.mxu1 }
  0xab   :  { %v198_v21 = vpop.f32.mrf.mxu0 }
  0xac   :  { %v1838_v22 = vadd.f32 %v1408_v16, %v198_v21 }
  0xad   :  { %v462_v58 = vpop.f32.mrf.mxu3 }
  0xae   :  { %v220_v23 = vmax.f32 %v1838_v22, 0.0 }
  0xb0   :  { %1373 = vmatmul.msk.f32.gmra.mxu0 %vm378_vm3, %v220_v23 }
  0xb3   :  { %v201_v24 = vpop.f32.mrf.mxu0 }
  0xb4   :  { %v1842_v25 = vadd.f32 %v1408_v16, %v201_v24  ;;  %v141_v24 = vld [vmem:[%s2231_s26 + $0x10] sm:$0xff] }
  0xb5   :  { %1334 = vmatmul.msk.f32.gmra.mxu1 %vm228_vm1, %v141_v24 }
  0xb6   :  { %v221_v26 = vmax.f32 %v1842_v25, 0.0 }
  0xb8   :  { %1374 = vmatmul.msk.f32.gmra.mxu0 %vm378_vm3, %v221_v26  ;;  %v142_v26 = vld [vmem:[%s2231_s26 + $0x18] sm:$0xff] }
  0xbb   :  { %v204_v34 = vpop.f32.mrf.mxu0 }
  0xbc   :  { %v1876_v35 = vadd.f32 %v1408_v16, %v204_v34 }
  0xbd   :  { %1335 = vmatmul.msk.f32.gmra.mxu1 %vm228_vm1, %v142_v26 }
  0xbe   :  { %v222_v36 = vmax.f32 %v1876_v35, 0.0 }
  0xc0   :  { %1375 = vmatmul.msk.f32.gmra.mxu0 %vm378_vm3, %v222_v36 }
  0xc3   :  { %v207_v40 = vpop.f32.mrf.mxu0 }
  0xc4   :  { %v1881_v41 = vadd.f32 %v1408_v16, %v207_v40 }
  0xc5   :  { %1336 = vmatmul.msk.f32.gmra.mxu1 %vm228_vm1, %v143_v31 }
  0xc6   :  { %v223_v42 = vmax.f32 %v1881_v41, 0.0 }
  0xc8   :  { %1376 = vmatmul.msk.f32.gmra.mxu0 %vm378_vm3, %v223_v42 }
  0xcb   :  { %v210_v43 = vpop.f32.mrf.mxu0 }
  0xcc   :  { %v1885_v44 = vadd.f32 %v1408_v16, %v210_v43 }
  0xcd   :  { %1337 = vmatmul.msk.f32.gmra.mxu1 %vm228_vm1, %v144_v33 }
  0xce   :  { %v224_v45 = vmax.f32 %v1885_v44, 0.0 }
  0xd0   :  { %1377 = vmatmul.msk.f32.gmra.mxu0 %vm378_vm3, %v224_v45 }
  0xd3   :  { %v213_v46 = vpop.f32.mrf.mxu0 }
  0xd4   :  { %v1889_v47 = vadd.f32 %v1408_v16, %v213_v46 }
  0xd6   :  { %v225_v48 = vmax.f32 %v1889_v47, 0.0 }
  0xd8   :  { %1378 = vmatmul.msk.f32.gmra.mxu0 %vm378_vm3, %v225_v48 }
  0xdb   :  { %v216_v49 = vpop.f32.mrf.mxu0 }
  0xdc   :  { %v1893_v50 = vadd.f32 %v1408_v16, %v216_v49 }
  0xde   :  { %v226_v53 = vmax.f32 %v1893_v50, 0.0 }
  0xe0   :  { %1379 = vmatmul.msk.f32.gmra.mxu0 %vm378_vm3, %v226_v53 }
 0x115   :  { %v307_v37 = vpop.permute.xlu0 %306 }
 0x116   :  { %v330_v38 = vadd.f32 %v307_v37, %v196_v18  ;;  %v145_v37 = vld [vmem:[%s2231_s26 + $0x30] sm:$0xff] }
 0x117   :  { %1338 = vmatmul.msk.f32.gmra.mxu1 %vm228_vm1, %v145_v37 }
 0x118   :  { %v338_v39 = vmax.f32 %v330_v38, 0.0  ;;  %v146_v38 = vld [vmem:[%s2231_s26 + $0x38] sm:$0xff] }
 0x11a   :  { %362 = vrot.lane.b32.xlu0 %v338_v39, %s1663_s28  ;;  %v952_v39 = vld [vmem:[%s2214_s11] sm:$0xff] }
 0x11f   :  { %1339 = vmatmul.msk.f32.gmra.mxu1 %vm228_vm1, %v146_v38 }
 0x132   :  { %v280_v43 = vpop.f32.mrf.mxu1 }
 0x18c   :  { %v363_v54 = vpop.permute.xlu0 %362 }
 0x18d   :  { %1340 = vmatmul.msk.f32.vlgmr.msra.gmra.mxu2 %vm378_vm3, %v363_v54 }
 0x210   :  { %v412_v57 = vpop.f32.mrf.mxu2 }
 0x211   :  { %v413_v59 = vadd.f32 %v1923_v56, %v412_v57 }
 0x213   :  { %v465_v60 = vadd.f32 %v462_v58, %v413_v59 }
 0x215   :  { %1413 = vtanh.f32 %v465_v60  ;;  %v1349_v63 = vmul.f32 -1.442695, %v465_v60 }
 0x217   :  { %1415 = vpow2.f32 %v1349_v63 }
 0x21b   :  { %v1414_v61 = vpop.eup %1413 }
 0x21c   :  { %492 = vrot.lane.b32.xlu1 %v1414_v61, %s1664_s29 }
 0x21d   :  { %v1416_v0 = vpop.eup %1415 }
 0x21e   :  { %v469_v1 = vadd.f32 1.0, %v1416_v0 }
 0x220   :  { %1417 = vrcp.f32 %v469_v1  ;;  %v481_v7 = vand.u32 2147483648, %v469_v1  ;;  %vm475_vm5 = vweird.f32 %v469_v1  ;;  %v479_v8 = vand.u32 2147483647, %v469_v1 }
 0x222   :  { %v482_v10 = vor.u32 1.1754944e-38, %v481_v7  ;;  %vm480_vm7 = vcmp.eq.f32.partialorder %v479_v8, 8.507059e+37 }
 0x224   :  { %487 = vrot.lane.b32.xlu1 %v441_v62, %s1662_s3 }
 0x226   :  { %v1418_v2 = vpop.eup %1417 }
 0x227   :  { %v471_v3 = vmul.f32 %v1418_v2, %v469_v1  ;;  %vm476_vm4 = vweird.f32 %v1418_v2 }
 0x228   :  { %vm477_vm6 = vmor %vm475_vm5, %vm476_vm4 }
 0x229   :  { %v472_v4 = vsub.f32 1.0, %v471_v3 }
 0x22b   :  { %v473_v5 = vmul.f32 %v1418_v2, %v472_v4 }
 0x22d   :  { %v474_v6 = vadd.f32 %v1418_v2, %v473_v5 }
 0x22f   :  { %v478_v9 = vsel %vm477_vm6, %v1418_v2, %v474_v6 }
 0x230   :  { %v483_v12 = vsel %vm480_vm7, %v482_v10, %v478_v9 }
 0x28e   :  { %v493_v11 = vpop.permute.xlu1 %492 }
 0x28f   :  { %v495_v13 = vmul.f32 %v493_v11, %v483_v12 }
 0x291   :  { %497 = vrot.lane.b32.xlu2 %v495_v13, %s1662_s3 }
 0x296   :  { %v488_v15 = vpop.permute.xlu1 %487 }
 0x297   :  { %v490_v16 = vmul.f32 %v488_v15, %v483_v12  ;;  %v283_v15 = vpop.f32.mrf.mxu1 }
 0x299   :  { %308 = vrot.lane.b32.xlu2 %v277_v14, %s1662_s3 }
 0x2eb   :  { %v498_v17 = vpop.permute.xlu2 %497 }
 0x2ec   :  { %v1930_v18 = vadd.f32 %v498_v17, %v490_v16 }
 0x2ee   :  { %1419 = vtanh.f32 %v1930_v18 }
 0x2f3   :  { %v309_v20 = vpop.permute.xlu2 %308 }
 0x2f4   :  { %v1420_v19 = vpop.eup %1419  ;;  %v331_v21 = vadd.f32 %v309_v20, %v1838_v22  ;;  %v954_v22 = vld [vmem:[%s2214_s11 + $0x10] sm:$0xff] }
 0x2f5   :  { %503 = vrot.lane.b32.xlu0 %v1420_v19, %s1664_s29  ;;  %974 = vmatpush.msrb.mxu1 %v954_v22 }
 0x2f6   :  { %v339_v23 = vmax.f32 %v331_v21, 0.0 }
 0x2f7   :  { %975 = vmatpush.msrb.mxu1 %v953_v28 }
 0x2f8   :  { %364 = vrot.lane.b32.xlu1 %v339_v23, %s1663_s28 }
 0x2f9   :  { %976 = vmatpush.msrb.mxu1 %v952_v39 }
 0x367   :  { %v504_v34 = vpop.permute.xlu0 %503 }
 0x368   :  { %v506_v36 = vmul.f32 %v504_v34, %v483_v12 }
 0x36a   :  { %508 = vrot.lane.b32.xlu2 %v506_v36, %s1662_s3  ;;  %v365_v40 = vpop.permute.xlu1 %364 }
 0x36b   :  { %1341 = vmatmul.msk.f32.gmra.mxu2 %vm378_vm3, %v365_v40 }
 0x372   :  { %310 = vrot.lane.b32.xlu2 %v280_v43, %s1662_s3 }
 0x3c4   :  { %v509_v42 = vpop.permute.xlu2 %508 }
 0x3c5   :  { %1350 = vmatmul.msk.f32.vlgmr.msrb.gmra.mxu3 %vm378_vm3, %v509_v42  ;;  %1364 = vmatmul.msk.f32.vlgmr.msrb.gmra.mxu1 %vm378_vm3, %v509_v42 }
 0x3c6   :  { %650 = vmatpush.msrb.mxu3 %v1854_v29 }
 0x3c8   :  { %651 = vmatpush.msrb.mxu3 %v1860_v30 }
 0x3ca   :  { %652 = vmatpush.msrb.mxu3 %v1868_v32 }
 0x3cc   :  { %653 = vmatpush.msrb.mxu3 %v1898_v51  ;;  %v311_v5 = vpop.permute.xlu2 %310 }
 0x3cd   :  { %v332_v6 = vadd.f32 %v311_v5, %v1842_v25 }
 0x3cf   :  { %v340_v7 = vmax.f32 %v332_v6, 0.0 }
 0x3ee   :  { %v415_v45 = vpop.f32.mrf.mxu2 }
 0x3ef   :  { %v416_v46 = vadd.f32 %v1923_v56, %v415_v45 }
 0x448   :  { %v529_v48 = vpop.f32.mrf.mxu3 }
 0x449   :  { %v532_v49 = vadd.f32 %v529_v48, %v416_v46 }
 0x44b   :  { %1421 = vtanh.f32 %v532_v49  ;;  %v1351_v53 = vmul.f32 -1.442695, %v532_v49 }
 0x44d   :  { %1423 = vpow2.f32 %v1351_v53 }
 0x451   :  { %v1422_v52 = vpop.eup %1421 }
 0x452   :  { %555 = vrot.lane.b32.xlu0 %v1422_v52, %s1664_s29 }
 0x453   :  { %v1424_v54 = vpop.eup %1423 }
 0x454   :  { %v536_v55 = vadd.f32 1.0, %v1424_v54 }
 0x456   :  { %1425 = vrcp.f32 %v536_v55  ;;  %v548_v62 = vand.u32 2147483648, %v536_v55  ;;  %vm542_vm9 = vweird.f32 %v536_v55  ;;  %v546_v63 = vand.u32 2147483647, %v536_v55 }
 0x458   :  { %v549_v1 = vor.u32 1.1754944e-38, %v548_v62  ;;  %vm547_vm11 = vcmp.eq.f32.partialorder %v546_v63, 8.507059e+37 }
 0x45c   :  { %v1426_v57 = vpop.eup %1425 }
 0x45d   :  { %v538_v58 = vmul.f32 %v1426_v57, %v536_v55  ;;  %vm543_vm8 = vweird.f32 %v1426_v57 }
 0x45e   :  { %vm544_vm10 = vmor %vm542_vm9, %vm543_vm8 }
 0x45f   :  { %v539_v59 = vsub.f32 1.0, %v538_v58 }
 0x461   :  { %v540_v60 = vmul.f32 %v1426_v57, %v539_v59 }
 0x463   :  { %v541_v61 = vadd.f32 %v1426_v57, %v540_v60 }
 0x465   :  { %v545_v0 = vsel %vm544_vm10, %v1426_v57, %v541_v61  ;;  %v286_v57 = vpop.f32.mrf.mxu1 }
 0x466   :  { %v550_v3 = vsel %vm547_vm11, %v549_v1, %v545_v0 }
 0x467   :  { %v553_v8 = vmul.f32 %v550_v3, %v1930_v18 }
 0x4c4   :  { %v556_v2 = vpop.permute.xlu0 %555 }
 0x4c5   :  { %v558_v4 = vmul.f32 %v556_v2, %v550_v3 }
 0x4c7   :  { %560 = vrot.lane.b32.xlu1 %v558_v4, %s1662_s3 }
 0x4cf   :  { %366 = vrot.lane.b32.xlu1 %v340_v7, %s1663_s28 }
 0x539   :  { %v561_v9 = vpop.permute.xlu1 %560 }
 0x53a   :  { %v563_v10 = vadd.f32 %v561_v9, %v553_v8 }
 0x53c   :  { %1427 = vtanh.f32 %v563_v10 }
 0x541   :  { %v367_v12 = vpop.permute.xlu1 %366 }
 0x542   :  { %v1428_v11 = vpop.eup %1427  ;;  %1342 = vmatmul.msk.f32.gmra.mxu2 %vm378_vm3, %v367_v12 }
 0x543   :  { %566 = vrot.lane.b32.xlu0 %v1428_v11, %s1664_s29 }
 0x5b5   :  { %v567_v13 = vpop.permute.xlu0 %566 }
 0x5b6   :  { %v569_v14 = vmul.f32 %v567_v13, %v550_v3 }
 0x5b8   :  { %571 = vrot.lane.b32.xlu2 %v569_v14, %s1662_s3 }
 0x5c0   :  { %312 = vrot.lane.b32.xlu2 %v283_v15, %s1662_s3 }
 0x5c5   :  { %v418_v16 = vpop.f32.mrf.mxu2 }
 0x5c6   :  { %v419_v17 = vadd.f32 %v1923_v56, %v418_v16 }
 0x612   :  { %v572_v25 = vpop.permute.xlu2 %571 }
 0x613   :  { %1352 = vmatmul.msk.f32.vlgmr.msra.gmra.mxu3 %vm378_vm3, %v572_v25  ;;  %1365 = vmatmul.msk.f32.gmra.mxu1 %vm378_vm3, %v572_v25 }
 0x614   :  { %713 = vmatpush.msra.mxu3 %v1854_v29 }
 0x616   :  { %714 = vmatpush.msra.mxu3 %v1860_v30 }
 0x618   :  { %715 = vmatpush.msra.mxu3 %v1868_v32 }
 0x61a   :  { %716 = vmatpush.msra.mxu3 %v1898_v51  ;;  %v313_v42 = vpop.permute.xlu2 %312 }
 0x61b   :  { %v333_v43 = vadd.f32 %v313_v42, %v1876_v35 }
 0x61d   :  { %v341_v45 = vmax.f32 %v333_v43, 0.0 }
 0x696   :  { %v592_v18 = vpop.f32.mrf.mxu3 }
 0x697   :  { %v595_v19 = vadd.f32 %v592_v18, %v419_v17 }
 0x699   :  { %1429 = vtanh.f32 %v595_v19  ;;  %v1353_v21 = vmul.f32 -1.442695, %v595_v19 }
 0x69b   :  { %1431 = vpow2.f32 %v1353_v21 }
 0x69f   :  { %v1430_v20 = vpop.eup %1429 }
 0x6a0   :  { %618 = vrot.lane.b32.xlu0 %v1430_v20, %s1664_s29 }
 0x6a1   :  { %v1432_v23 = vpop.eup %1431 }
 0x6a2   :  { %v599_v24 = vadd.f32 1.0, %v1432_v23 }
 0x6a4   :  { %1433 = vrcp.f32 %v599_v24  ;;  %v611_v33 = vand.u32 2147483648, %v599_v24  ;;  %vm605_vm13 = vweird.f32 %v599_v24  ;;  %v609_v34 = vand.u32 2147483647, %v599_v24 }
 0x6a6   :  { %v612_v37 = vor.u32 1.1754944e-38, %v611_v33  ;;  %vm610_vm15 = vcmp.eq.f32.partialorder %v609_v34, 8.507059e+37 }
 0x6aa   :  { %v1434_v26 = vpop.eup %1433 }
 0x6ab   :  { %v601_v27 = vmul.f32 %v1434_v26, %v599_v24  ;;  %vm606_vm12 = vweird.f32 %v1434_v26  ;;  %v289_v24 = vpop.f32.mrf.mxu1 }
 0x6ac   :  { %vm607_vm14 = vmor %vm605_vm13, %vm606_vm12 }
 0x6ad   :  { %v602_v22 = vsub.f32 1.0, %v601_v27 }
 0x6af   :  { %v603_v28 = vmul.f32 %v1434_v26, %v602_v22 }
 0x6b1   :  { %v604_v31 = vadd.f32 %v1434_v26, %v603_v28 }
 0x6b3   :  { %v608_v36 = vsel %vm607_vm14, %v1434_v26, %v604_v31 }
 0x6b4   :  { %v613_v39 = vsel %vm610_vm15, %v612_v37, %v608_v36 }
 0x6b5   :  { %v616_v46 = vmul.f32 %v613_v39, %v563_v10 }
 0x712   :  { %v619_v38 = vpop.permute.xlu0 %618 }
 0x713   :  { %v621_v40 = vmul.f32 %v619_v38, %v613_v39 }
 0x715   :  { %623 = vrot.lane.b32.xlu1 %v621_v40, %s1662_s3 }
 0x71d   :  { %368 = vrot.lane.b32.xlu1 %v341_v45, %s1663_s28 }
 0x787   :  { %v624_v48 = vpop.permute.xlu1 %623 }
 0x788   :  { %v626_v49 = vadd.f32 %v624_v48, %v616_v46 }
 0x78a   :  { %1435 = vtanh.f32 %v626_v49 }
 0x78f   :  { %v369_v53 = vpop.permute.xlu1 %368 }
 0x790   :  { %v1436_v52 = vpop.eup %1435  ;;  %1343 = vmatmul.msk.f32.gmra.mxu2 %vm378_vm3, %v369_v53 }
 0x791   :  { %629 = vrot.lane.b32.xlu0 %v1436_v52, %s1664_s29 }
 0x803   :  { %v630_v54 = vpop.permute.xlu0 %629 }
 0x804   :  { %v632_v55 = vmul.f32 %v630_v54, %v613_v39 }
 0x806   :  { %634 = vrot.lane.b32.xlu2 %v632_v55, %s1662_s3 }
 0x80e   :  { %314 = vrot.lane.b32.xlu2 %v286_v57, %s1662_s3 }
 0x813   :  { %v421_v58 = vpop.f32.mrf.mxu2 }
 0x814   :  { %v422_v59 = vadd.f32 %v1923_v56, %v421_v58 }
 0x860   :  { %v635_v35 = vpop.permute.xlu2 %634 }
 0x861   :  { %1354 = vmatmul.msk.f32.vlgmr.msrb.gmra.mxu3 %vm378_vm3, %v635_v35  ;;  %1366 = vmatmul.msk.f32.gmra.mxu1 %vm378_vm3, %v635_v35 }
 0x862   :  { %776 = vmatpush.msrb.mxu3 %v1854_v29 }
 0x864   :  { %777 = vmatpush.msrb.mxu3 %v1860_v30 }
 0x866   :  { %778 = vmatpush.msrb.mxu3 %v1868_v32 }
 0x868   :  { %779 = vmatpush.msrb.mxu3 %v1898_v51  ;;  %v315_v14 = vpop.permute.xlu2 %314 }
 0x869   :  { %v334_v15 = vadd.f32 %v315_v14, %v1881_v41 }
 0x86b   :  { %v342_v25 = vmax.f32 %v334_v15, 0.0 }
 0x8e4   :  { %v655_v60 = vpop.f32.mrf.mxu3 }
 0x8e5   :  { %v658_v61 = vadd.f32 %v655_v60, %v422_v59 }
 0x8e7   :  { %1437 = vtanh.f32 %v658_v61  ;;  %v1355_v63 = vmul.f32 -1.442695, %v658_v61 }
 0x8e9   :  { %1439 = vpow2.f32 %v1355_v63 }
 0x8ed   :  { %v1438_v62 = vpop.eup %1437 }
 0x8ee   :  { %681 = vrot.lane.b32.xlu0 %v1438_v62, %s1664_s29 }
 0x8ef   :  { %v1440_v0 = vpop.eup %1439 }
 0x8f0   :  { %v662_v1 = vadd.f32 1.0, %v1440_v0  ;;  %v292_v0 = vpop.f32.mrf.mxu1 }
 0x8f2   :  { %1441 = vrcp.f32 %v662_v1  ;;  %v674_v7 = vand.u32 2147483648, %v662_v1  ;;  %vm668_vm1 = vweird.f32 %v662_v1  ;;  %v672_v8 = vand.u32 2147483647, %v662_v1 }
 0x8f4   :  { %v675_v10 = vor.u32 1.1754944e-38, %v674_v7  ;;  %vm673_vm4 = vcmp.eq.f32.partialorder %v672_v8, 8.507059e+37 }
 0x8f8   :  { %v1442_v2 = vpop.eup %1441 }
 0x8f9   :  { %v664_v3 = vmul.f32 %v1442_v2, %v662_v1  ;;  %vm669_vm0 = vweird.f32 %v1442_v2 }
 0x8fa   :  { %vm670_vm2 = vmor %vm668_vm1, %vm669_vm0 }
 0x8fb   :  { %v665_v4 = vsub.f32 1.0, %v664_v3 }
 0x8fd   :  { %v666_v5 = vmul.f32 %v1442_v2, %v665_v4 }
 0x8ff   :  { %v667_v6 = vadd.f32 %v1442_v2, %v666_v5 }
 0x901   :  { %v671_v9 = vsel %vm670_vm2, %v1442_v2, %v667_v6  ;;  %vm1268_vm2 = vcmask 64512  }
 0x902   :  { %v676_v12 = vsel %vm673_vm4, %v675_v10, %v671_v9 }
 0x903   :  { %v679_v16 = vmul.f32 %v676_v12, %v626_v49 }
 0x960   :  { %v682_v11 = vpop.permute.xlu0 %681 }
 0x961   :  { %v684_v13 = vmul.f32 %v682_v11, %v676_v12 }
 0x963   :  { %686 = vrot.lane.b32.xlu1 %v684_v13, %s1662_s3 }
 0x96b   :  { %370 = vrot.lane.b32.xlu1 %v342_v25, %s1663_s28 }
 0x9d5   :  { %v687_v17 = vpop.permute.xlu1 %686 }
 0x9d6   :  { %v689_v18 = vadd.f32 %v687_v17, %v679_v16 }
 0x9d8   :  { %1443 = vtanh.f32 %v689_v18 }
 0x9dd   :  { %v371_v20 = vpop.permute.xlu1 %370 }
 0x9de   :  { %v1444_v19 = vpop.eup %1443  ;;  %1344 = vmatmul.msk.f32.gmra.mxu2 %vm378_vm3, %v371_v20 }
 0x9df   :  { %692 = vrot.lane.b32.xlu0 %v1444_v19, %s1664_s29 }
 0xa51   :  { %v693_v21 = vpop.permute.xlu0 %692 }
 0xa52   :  { %v695_v23 = vmul.f32 %v693_v21, %v676_v12 }
 0xa54   :  { %697 = vrot.lane.b32.xlu2 %v695_v23, %s1662_s3 }
 0xa5c   :  { %316 = vrot.lane.b32.xlu2 %v289_v24, %s1662_s3 }
 0xa61   :  { %v424_v26 = vpop.f32.mrf.mxu2 }
 0xa62   :  { %v425_v27 = vadd.f32 %v1923_v56, %v424_v26 }
 0xaae   :  { %v698_v41 = vpop.permute.xlu2 %697 }
 0xaaf   :  { %1356 = vmatmul.msk.f32.vlgmr.msra.gmra.mxu3 %vm378_vm3, %v698_v41  ;;  %1367 = vmatmul.msk.f32.gmra.mxu1 %vm378_vm3, %v698_v41 }
 0xab0   :  { %839 = vmatpush.msra.mxu3 %v1854_v29 }
 0xab2   :  { %840 = vmatpush.msra.mxu3 %v1860_v30 }
 0xab4   :  { %841 = vmatpush.msra.mxu3 %v1868_v32 }
 0xab6   :  { %842 = vmatpush.msra.mxu3 %v1898_v51  ;;  %v317_v54 = vpop.permute.xlu2 %316 }
 0xab7   :  { %v335_v55 = vadd.f32 %v317_v54, %v1885_v44 }
 0xab9   :  { %v343_v57 = vmax.f32 %v335_v55, 0.0 }
 0xb32   :  { %v718_v22 = vpop.f32.mrf.mxu3 }
 0xb33   :  { %v721_v28 = vadd.f32 %v718_v22, %v425_v27  ;;  %v295_v27 = vpop.f32.mrf.mxu1 }
 0xb35   :  { %1445 = vtanh.f32 %v721_v28  ;;  %v1357_v33 = vmul.f32 -1.442695, %v721_v28 }
 0xb37   :  { %1447 = vpow2.f32 %v1357_v33 }
 0xb3b   :  { %v1446_v31 = vpop.eup %1445 }
 0xb3c   :  { %744 = vrot.lane.b32.xlu0 %v1446_v31, %s1664_s29 }
 0xb3d   :  { %v1448_v34 = vpop.eup %1447 }
 0xb3e   :  { %v725_v36 = vadd.f32 1.0, %v1448_v34 }
 0xb40   :  { %1449 = vrcp.f32 %v725_v36  ;;  %v737_v43 = vand.u32 2147483648, %v725_v36  ;;  %vm731_vm6 = vweird.f32 %v725_v36  ;;  %v735_v45 = vand.u32 2147483647, %v725_v36 }
 0xb42   :  { %v738_v48 = vor.u32 1.1754944e-38, %v737_v43  ;;  %vm736_vm8 = vcmp.eq.f32.partialorder %v735_v45, 8.507059e+37 }
 0xb46   :  { %v1450_v37 = vpop.eup %1449 }
 0xb47   :  { %v727_v38 = vmul.f32 %v1450_v37, %v725_v36  ;;  %vm732_vm5 = vweird.f32 %v1450_v37 }
 0xb48   :  { %vm733_vm7 = vmor %vm731_vm6, %vm732_vm5 }
 0xb49   :  { %v728_v39 = vsub.f32 1.0, %v727_v38 }
 0xb4b   :  { %v729_v40 = vmul.f32 %v1450_v37, %v728_v39 }
 0xb4d   :  { %v730_v42 = vadd.f32 %v1450_v37, %v729_v40 }
 0xb4f   :  { %v734_v46 = vsel %vm733_vm7, %v1450_v37, %v730_v42 }
 0xb50   :  { %v739_v52 = vsel %vm736_vm8, %v738_v48, %v734_v46 }
 0xb51   :  { %v742_v35 = vmul.f32 %v739_v52, %v689_v18 }
 0xbae   :  { %v745_v49 = vpop.permute.xlu0 %744 }
 0xbaf   :  { %v747_v53 = vmul.f32 %v745_v49, %v739_v52 }
 0xbb1   :  { %749 = vrot.lane.b32.xlu1 %v747_v53, %s1662_s3 }
 0xbb9   :  { %372 = vrot.lane.b32.xlu1 %v343_v57, %s1663_s28 }
 0xc23   :  { %v750_v58 = vpop.permute.xlu1 %749 }
 0xc24   :  { %v752_v59 = vadd.f32 %v750_v58, %v742_v35 }
 0xc26   :  { %1451 = vtanh.f32 %v752_v59 }
 0xc2b   :  { %v373_v61 = vpop.permute.xlu1 %372 }
 0xc2c   :  { %v1452_v60 = vpop.eup %1451  ;;  %1345 = vmatmul.msk.f32.gmra.mxu2 %vm378_vm3, %v373_v61  ;;  %v1088_v61 = vld [vmem:[%s2216_s13 + $0x8] sm:$0xff] }
 0xc2d   :  { %755 = vrot.lane.b32.xlu0 %v1452_v60, %s1664_s29  ;;  %v1089_v60 = vld [vmem:[%s2216_s13 + $0x10] sm:$0xff] }
 0xc9f   :  { %v756_v62 = vpop.permute.xlu0 %755 }
 0xca0   :  { %v758_v63 = vmul.f32 %v756_v62, %v739_v52 }
 0xca2   :  { %760 = vrot.lane.b32.xlu2 %v758_v63, %s1662_s3 }
 0xcaa   :  { %318 = vrot.lane.b32.xlu2 %v292_v0, %s1662_s3 }
 0xcaf   :  { %v427_v1 = vpop.f32.mrf.mxu2 }
 0xcb0   :  { %v428_v2 = vadd.f32 %v1923_v56, %v427_v1  ;;  %v1043_v1 = vpop.f32.mrf.mxu0 }
 0xcfc   :  { %v761_v44 = vpop.permute.xlu2 %760 }
 0xcfd   :  { %1358 = vmatmul.msk.f32.vlgmr.msrb.gmra.mxu3 %vm378_vm3, %v761_v44  ;;  %1368 = vmatmul.msk.f32.gmra.mxu1 %vm378_vm3, %v761_v44  ;;  %v978_v44 = vpop.f32.mrf.mxu1 }
 0xcfe   :  { %902 = vmatpush.msrb.mxu3 %v1854_v29 }
 0xd00   :  { %903 = vmatpush.msrb.mxu3 %v1860_v30 }
 0xd02   :  { %904 = vmatpush.msrb.mxu3 %v1868_v32 }
 0xd04   :  { %905 = vmatpush.msrb.mxu3 %v1898_v51  ;;  %v319_v16 = vpop.permute.xlu2 %318 }
 0xd05   :  { %v336_v17 = vadd.f32 %v319_v16, %v1889_v47 }
 0xd07   :  { %v344_v18 = vmax.f32 %v336_v17, 0.0 }
 0xd80   :  { %v781_v3 = vpop.f32.mrf.mxu3 }
 0xd81   :  { %v784_v4 = vadd.f32 %v781_v3, %v428_v2  ;;  %v1044_v2 = vadd.f32 %v1043_v1, %v978_v44  ;;  %v2073_v3 = vld [vmem:[#allocation7] ss:$0 sm:$0xff] }
 0xd83   :  { %1453 = vtanh.f32 %v784_v4  ;;  %v1359_v6 = vmul.f32 -1.442695, %v784_v4 }
 0xd85   :  { %1455 = vpow2.f32 %v1359_v6  ;;  %v1071_v6 = vadd.f32 %v2073_v3, %v1044_v2 }
 0xd89   :  { %v1454_v5 = vpop.eup %1453 }
 0xd8a   :  { %807 = vrot.lane.b32.xlu0 %v1454_v5, %s1664_s29 }
 0xd8b   :  { %v1456_v7 = vpop.eup %1455 }
 0xd8c   :  { %v788_v8 = vadd.f32 1.0, %v1456_v7  ;;  %v981_v7 = vpop.f32.mrf.mxu1 }
 0xd8e   :  { %1457 = vrcp.f32 %v788_v8  ;;  %v800_v51 = vand.u32 2147483648, %v788_v8  ;;  %vm794_vm10 = vweird.f32 %v788_v8  ;;  %v798_v11 = vand.u32 2147483647, %v788_v8 }
 0xd90   :  { %v801_v13 = vor.u32 1.1754944e-38, %v800_v51  ;;  %vm799_vm12 = vcmp.eq.f32.partialorder %v798_v11, 8.507059e+37 }
 0xd94   :  { %v1458_v29 = vpop.eup %1457 }
 0xd95   :  { %v790_v30 = vmul.f32 %v1458_v29, %v788_v8  ;;  %vm795_vm9 = vweird.f32 %v1458_v29  ;;  %v1046_v8 = vpop.f32.mrf.mxu0 }
 0xd96   :  { %vm796_vm11 = vmor %vm794_vm10, %vm795_vm9 }
 0xd97   :  { %v791_v9 = vsub.f32 1.0, %v790_v30  ;;  %v1047_v30 = vadd.f32 %v1046_v8, %v981_v7  ;;  %v1241_v7 = vlaneseq  ;;  %v2121_v8 = vld [vmem:[#allocation10] ss:$0 sm:$0xff] }
 0xd99   :  { %v792_v32 = vmul.f32 %v1458_v29, %v791_v9  ;;  %v1072_v9 = vadd.f32 %v2073_v3, %v1047_v30  ;;  %v2123_v30 = vand.u32 127, %v1241_v7 }
 0xd9b   :  { %v793_v10 = vadd.f32 %v1458_v29, %v792_v32  ;;  %v984_v32 = vpop.f32.mrf.mxu1  ;;  %v1080_v51 = vmax.f32 %v1072_v9, 0.0  ;;  %vm1243_vm1 = vcmp.lt.s32.totalorder %v2123_v30, 4 }
 0xd9d   :  { %v797_v12 = vsel %vm796_vm11, %v1458_v29, %v793_v10  ;;  %v1079_v29 = vmax.f32 %v1071_v6, 0.0  ;;  %v1049_v10 = vpop.f32.mrf.mxu0 }
 0xd9e   :  { %v802_v15 = vsel %vm799_vm12, %v801_v13, %v797_v12  ;;  %v1050_v11 = vadd.f32 %v1049_v10, %v984_v32 }
 0xd9f   :  { %v805_v19 = vmul.f32 %v802_v15, %v752_v59  ;;  %v1090_v59 = vld [vmem:[%s2216_s13 + $0x18] sm:$0xff] }
 0xda0   :  { %1131 = vmatpush.msrb.mxu2 %v1090_v59  ;;  %v1073_v12 = vadd.f32 %v2073_v3, %v1050_v11 }
 0xda2   :  { %1132 = vmatpush.msrb.mxu2 %v1089_v60 }
 0xda3   :  { %v987_v13 = vpop.f32.mrf.mxu1 }
 0xda4   :  { %1133 = vmatpush.msrb.mxu2 %v1088_v61 }
 0xdab   :  { %v990_v17 = vpop.f32.mrf.mxu1 }
 0xdfc   :  { %v808_v14 = vpop.permute.xlu0 %807 }
 0xdfd   :  { %v810_v25 = vmul.f32 %v808_v14, %v802_v15  ;;  %v1052_v14 = vpop.f32.mrf.mxu0 }
 0xdff   :  { %812 = vrot.lane.b32.xlu1 %v810_v25, %s1662_s3  ;;  %v1053_v25 = vadd.f32 %v1052_v14, %v987_v13 }
 0xe01   :  { %v1074_v16 = vadd.f32 %v2073_v3, %v1053_v25 }
 0xe07   :  { %374 = vrot.lane.b32.xlu1 %v344_v18, %s1663_s28  ;;  %v1055_v18 = vpop.f32.mrf.mxu0 }
 0xe71   :  { %v813_v20 = vpop.permute.xlu1 %812 }
 0xe72   :  { %v815_v21 = vadd.f32 %v813_v20, %v805_v19  ;;  %v1082_v19 = vmax.f32 %v1074_v16, 0.0  ;;  %v1056_v20 = vadd.f32 %v1055_v18, %v990_v17 }
 0xe74   :  { %1459 = vtanh.f32 %v815_v21 }
 0xe79   :  { %v375_v24 = vpop.permute.xlu1 %374 }
 0xe7a   :  { %v1460_v23 = vpop.eup %1459  ;;  %1346 = vmatmul.msk.f32.gmra.mxu2 %vm378_vm3, %v375_v24  ;;  %v1058_v24 = vpop.f32.mrf.mxu0 }
 0xe7b   :  { %818 = vrot.lane.b32.xlu0 %v1460_v23, %s1664_s29 }
 0xeed   :  { %v819_v41 = vpop.permute.xlu0 %818 }
 0xeee   :  { %v821_v26 = vmul.f32 %v819_v41, %v802_v15  ;;  %v1081_v15 = vmax.f32 %v1073_v12, 0.0 }
 0xef0   :  { %823 = vrot.lane.b32.xlu2 %v821_v26, %s1662_s3 }
 0xef8   :  { %320 = vrot.lane.b32.xlu2 %v295_v27, %s1662_s3 }
 0xefd   :  { %v430_v22 = vpop.f32.mrf.mxu2 }
 0xefe   :  { %v431_v28 = vadd.f32 %v1923_v56, %v430_v22 }
 0xf4a   :  { %v824_v47 = vpop.permute.xlu2 %823 }
 0xf4b   :  { %1360 = vmatmul.msk.f32.vlgmr.msra.gmra.mxu3 %vm378_vm3, %v824_v47  ;;  %1369 = vmatmul.msk.f32.gmra.mxu1 %vm378_vm3, %v824_v47 }
 0xf52   :  { %v321_v55 = vpop.permute.xlu2 %320 }
 0xf53   :  { %v337_v35 = vadd.f32 %v321_v55, %v1893_v50  ;;  %v1087_v50 = vld [vmem:[%s2216_s13] sm:$0xff] }
 0xf54   :  { %1134 = vmatpush.msrb.mxu2 %v1087_v50 }
 0xf55   :  { %v345_v58 = vmax.f32 %v337_v35, 0.0 }
 0xfc8   :  { %v993_v23 = vpop.f32.mrf.mxu1 }
 0xfc9   :  { %v1059_v26 = vadd.f32 %v1058_v24, %v993_v23 }
 0xfcb   :  { %v1076_v27 = vadd.f32 %v2073_v3, %v1059_v26 }
 0xfcd   :  { %v1084_v47 = vmax.f32 %v1076_v27, 0.0 }
 0xfce   :  { %v844_v31 = vpop.f32.mrf.mxu3 }
 0xfcf   :  { %v847_v33 = vadd.f32 %v844_v31, %v431_v28  ;;  %v1171_v31 = vld [vmem:[%s2218_s15 + $0x18] sm:$0xff] }
 0xfd0   :  { %1212 = vmatpush.msra.mxu3 %v1171_v31 }
 0xfd1   :  { %1461 = vtanh.f32 %v847_v33  ;;  %v1361_v36 = vmul.f32 -1.442695, %v847_v33  ;;  %v1170_v33 = vld [vmem:[%s2218_s15 + $0x10] sm:$0xff] }
 0xfd2   :  { %1213 = vmatpush.msra.mxu3 %v1170_v33 }
 0xfd3   :  { %1463 = vpow2.f32 %v1361_v36  ;;  %v1168_v36 = vld [vmem:[%s2218_s15] sm:$0xff] }
 0xfd7   :  { %v1462_v34 = vpop.eup %1461 }
 0xfd8   :  { %870 = vrot.lane.b32.xlu0 %v1462_v34, %s1664_s29  ;;  %v1169_v34 = vld [vmem:[%s2218_s15 + $0x8] sm:$0xff] }
 0xfd9   :  { %v1464_v37 = vpop.eup %1463  ;;  %1214 = vmatpush.msra.mxu3 %v1169_v34 }
 0xfda   :  { %v851_v38 = vadd.f32 1.0, %v1464_v37 }
 0xfdb   :  { %1215 = vmatpush.msra.mxu3 %v1168_v36 }
 0xfdc   :  { %1465 = vrcp.f32 %v851_v38  ;;  %v863_v46 = vand.u32 2147483648, %v851_v38  ;;  %vm857_vm14 = vweird.f32 %v851_v38  ;;  %v861_v48 = vand.u32 2147483647, %v851_v38 }
 0xfde   :  { %v864_v52 = vor.u32 1.1754944e-38, %v863_v46  ;;  %vm862_vm0 = vcmp.eq.f32.partialorder %v861_v48, 8.507059e+37 }
 0xfe2   :  { %v1466_v39 = vpop.eup %1465 }
 0xfe3   :  { %v853_v40 = vmul.f32 %v1466_v39, %v851_v38  ;;  %vm858_vm13 = vweird.f32 %v1466_v39 }
 0xfe4   :  { %vm859_vm15 = vmor %vm857_vm14, %vm858_vm13 }
 0xfe5   :  { %v854_v42 = vsub.f32 1.0, %v853_v40 }
 0xfe7   :  { %v855_v43 = vmul.f32 %v1466_v39, %v854_v42 }
 0xfe9   :  { %v856_v45 = vadd.f32 %v1466_v39, %v855_v43 }
 0xfeb   :  { %v860_v49 = vsel %vm859_vm15, %v1466_v39, %v856_v45  ;;  %v2102_v39 = vld [vmem:[#allocation8] ss:$0 sm:$0xff] }
 0xfec   :  { %v865_v54 = vsel %vm862_vm0, %v864_v52, %v860_v49 }
 0xfed   :  { %v868_v62 = vmul.f32 %v865_v54, %v815_v21  ;;  %v1075_v21 = vadd.f32 %v2073_v3, %v1056_v20 }
 0xfef   :  { %v1083_v41 = vmax.f32 %v1075_v21, 0.0 }
0x104a   :  { %v871_v53 = vpop.permute.xlu0 %870 }
0x104b   :  { %v873_v57 = vmul.f32 %v871_v53, %v865_v54 }
0x104d   :  { %875 = vrot.lane.b32.xlu1 %v873_v57, %s1662_s3 }
0x1055   :  { %376 = vrot.lane.b32.xlu1 %v345_v58, %s1663_s28 }
0x10bf   :  { %v876_v63 = vpop.permute.xlu1 %875 }
0x10c0   :  { %v2070_v0 = vadd.f32 %v876_v63, %v868_v62  ;;  %v1061_v62 = vpop.f32.mrf.mxu0 }
0x10c2   :  { %1467 = vtanh.f32 %v2070_v0 }
0x10c7   :  { %v377_v4 = vpop.permute.xlu1 %376 }
0x10c8   :  { %v1468_v5 = vpop.eup %1467  ;;  %1347 = vmatmul.msk.f32.gmra.mxu2 %vm378_vm3, %v377_v4 }
0x10c9   :  { %881 = vrot.lane.b32.xlu0 %v1468_v5, %s1664_s29 }
0x10d0   :  { %1380 = vmatmul.msk.f32.vlgmr.msrb.gmra.mxu2 %vm378_vm3, %v1079_v29 }
0x10d8   :  { %1381 = vmatmul.msk.f32.gmra.mxu2 %vm378_vm3, %v1080_v51 }
0x10e0   :  { %1382 = vmatmul.msk.f32.gmra.mxu2 %vm378_vm3, %v1081_v15 }
0x10e8   :  { %1383 = vmatmul.msk.f32.gmra.mxu2 %vm378_vm3, %v1082_v19 }
0x10f0   :  { %1384 = vmatmul.msk.f32.gmra.mxu2 %vm378_vm3, %v1083_v41 }
0x10f8   :  { %1385 = vmatmul.msk.f32.gmra.mxu2 %vm378_vm3, %v1084_v47 }
0x113b   :  { %v882_v22 = vpop.permute.xlu0 %881 }
0x113c   :  { %v884_v28 = vmul.f32 %v882_v22, %v865_v54 }
0x113e   :  { %886 = vrot.lane.b32.xlu2 %v884_v28, %s1662_s3 }
0x114b   :  { %v433_v37 = vpop.f32.mrf.mxu2 }
0x114c   :  { %v434_v1 = vadd.f32 %v1923_v56, %v433_v37 }
0x1153   :  { %v1136_v38 = vpop.f32.mrf.mxu2 }
0x1154   :  { %v1137_v43 = vadd.f32 %v2102_v39, %v1136_v38 }
0x1156   :  { %v1160_v45 = vmax.f32 %v1137_v43, 0.0 }
0x115b   :  { %v1139_v40 = vpop.f32.mrf.mxu2 }
0x115c   :  { %v1140_v48 = vadd.f32 %v2102_v39, %v1139_v40 }
0x115e   :  { %v1161_v49 = vmax.f32 %v1140_v48, 0.0 }
0x1163   :  { %v1142_v46 = vpop.f32.mrf.mxu2 }
0x1164   :  { %v1143_v52 = vadd.f32 %v2102_v39, %v1142_v46 }
0x1166   :  { %v1162_v54 = vmax.f32 %v1143_v52, 0.0 }
0x116b   :  { %v1145_v53 = vpop.f32.mrf.mxu2 }
0x116c   :  { %v1146_v55 = vadd.f32 %v2102_v39, %v1145_v53 }
0x116e   :  { %v1163_v35 = vmax.f32 %v1146_v55, 0.0 }
0x1173   :  { %v1148_v57 = vpop.f32.mrf.mxu2 }
0x1174   :  { %v1149_v58 = vadd.f32 %v2102_v39, %v1148_v57 }
0x1176   :  { %v1164_v59 = vmax.f32 %v1149_v58, 0.0 }
0x117b   :  { %v1151_v60 = vpop.f32.mrf.mxu2 }
0x117c   :  { %v1152_v61 = vadd.f32 %v2102_v39, %v1151_v60 }
0x117e   :  { %v1165_v50 = vmax.f32 %v1152_v61, 0.0 }
0x1198   :  { %v887_v42 = vpop.permute.xlu2 %886 }
0x1199   :  { %1362 = vmatmul.msk.f32.vlgmr.msrb.gmra.mxu3 %vm378_vm3, %v887_v42  ;;  %1370 = vmatmul.msk.f32.gmra.mxu1 %vm378_vm3, %v887_v42 }
0x11a1   :  { %1388 = vmatmul.msk.f32.vlgmr.msra.gmra.mxu3 %vm378_vm3, %v1160_v45 }
0x11a9   :  { %1389 = vmatmul.msk.f32.gmra.mxu3 %vm378_vm3, %v1161_v49 }
0x11b1   :  { %1390 = vmatmul.msk.f32.gmra.mxu3 %vm378_vm3, %v1162_v54 }
0x11b9   :  { %1391 = vmatmul.msk.f32.gmra.mxu3 %vm378_vm3, %v1163_v35 }
0x11c1   :  { %1392 = vmatmul.msk.f32.gmra.mxu3 %vm378_vm3, %v1164_v59 }
0x11c9   :  { %1393 = vmatmul.msk.f32.gmra.mxu3 %vm378_vm3, %v1165_v50 }
0x1216   :  { %v996_v63 = vpop.f32.mrf.mxu1 }
0x1217   :  { %v1062_v44 = vadd.f32 %v1061_v62, %v996_v63 }
0x1219   :  { %v1077_v2 = vadd.f32 %v2073_v3, %v1062_v44 }
0x121b   :  { %v1085_v4 = vmax.f32 %v1077_v2, 0.0 }
0x121c   :  { %v907_v5 = vpop.f32.mrf.mxu3 }
0x121d   :  { %v910_v6 = vadd.f32 %v907_v5, %v434_v1  ;;  %1386 = vmatmul.msk.f32.gmra.mxu2 %vm378_vm3, %v1085_v4 }
0x121f   :  { %1469 = vtanh.f32 %v910_v6  ;;  %v1363_v38 = vmul.f32 -1.442695, %v910_v6 }
0x1221   :  { %1471 = vpow2.f32 %v1363_v38 }
0x1224   :  { %v1217_v29 = vpop.f32.mrf.mxu3 }
0x1225   :  { %v1470_v9 = vpop.eup %1469  ;;  %v1218_v32 = vadd.f32 %v2121_v8, %v1217_v29 }
0x1226   :  { %933 = vrot.lane.b32.xlu0 %v1470_v9, %s1664_s29 }
0x1227   :  { %v1244_v56 = vmax.f32 %v1218_v32, -20.0  ;;  %v1472_v40 = vpop.eup %1471 }
0x1228   :  { %v914_v42 = vadd.f32 1.0, %v1472_v40 }
0x1229   :  { %v1252_v10 = vmin.f32 %v1244_v56, 2.0 }
0x122a   :  { %1473 = vrcp.f32 %v914_v42  ;;  %v926_v52 = vand.u32 2147483648, %v914_v42  ;;  %vm920_vm5 = vweird.f32 %v914_v42  ;;  %v924_v53 = vand.u32 2147483647, %v914_v42 }
0x122b   :  { %v1260_v51 = vsel %vm1243_vm1, %v1218_v32, %v1252_v10  ;;  %v1064_v32 = vpop.f32.mrf.mxu0 }
0x122c   :  { %1269 = vst.msk [vmem:[%s2220_s17] sm:$0xff] %vm1268_vm2, %v1260_v51  ;;  %v1220_v11 = vpop.f32.mrf.mxu3  ;;  %v927_v55 = vor.u32 1.1754944e-38, %v926_v52  ;;  %vm925_vm7 = vcmp.eq.f32.partialorder %v924_v53, 8.507059e+37 }
0x122d   :  { %v1221_v12 = vadd.f32 %v2121_v8, %v1220_v11 }
0x122f   :  { %v1245_v13 = vmax.f32 %v1221_v12, -20.0 }
0x1230   :  { %v1474_v43 = vpop.eup %1473 }
0x1231   :  { %v1253_v14 = vmin.f32 %v1245_v13, 2.0  ;;  %v916_v45 = vmul.f32 %v1474_v43, %v914_v42  ;;  %vm921_vm4 = vweird.f32 %v1474_v43 }
0x1232   :  { %vm922_vm6 = vmor %vm920_vm5, %vm921_vm4 }
0x1233   :  { %v1261_v15 = vsel %vm1243_vm1, %v1221_v12, %v1253_v14  ;;  %v917_v46 = vsub.f32 1.0, %v916_v45 }
0x1234   :  { %1270 = vst.msk [vmem:[%s2220_s17 + $0x8] sm:$0xff] %vm1268_vm2, %v1261_v15  ;;  %v1223_v25 = vpop.f32.mrf.mxu3 }
0x1235   :  { %v1224_v16 = vadd.f32 %v2121_v8, %v1223_v25  ;;  %v918_v48 = vmul.f32 %v1474_v43, %v917_v46 }
0x1237   :  { %v1246_v17 = vmax.f32 %v1224_v16, -20.0  ;;  %v919_v49 = vadd.f32 %v1474_v43, %v918_v48 }
0x1239   :  { %v1254_v18 = vmin.f32 %v1246_v17, 2.0  ;;  %v923_v54 = vsel %vm922_vm6, %v1474_v43, %v919_v49 }
0x123a   :  { %v928_v35 = vsel %vm925_vm7, %v927_v55, %v923_v54 }
0x123b   :  { %v1262_v19 = vsel %vm1243_vm1, %v1224_v16, %v1254_v18  ;;  %v931_v50 = vmul.f32 %v928_v35, %v2070_v0 }
0x123c   :  { %1271 = vst.msk [vmem:[%s2220_s17 + $0x10] sm:$0xff] %vm1268_vm2, %v1262_v19  ;;  %v1226_v20 = vpop.f32.mrf.mxu3 }
0x123d   :  { %v1227_v21 = vadd.f32 %v2121_v8, %v1226_v20 }
0x123f   :  { %v1247_v23 = vmax.f32 %v1227_v21, -20.0 }
0x1241   :  { %v1255_v24 = vmin.f32 %v1247_v23, 2.0 }
0x1243   :  { %v1263_v41 = vsel %vm1243_vm1, %v1227_v21, %v1255_v24 }
0x1244   :  { %1272 = vst.msk [vmem:[%s2220_s17 + $0x18] sm:$0xff] %vm1268_vm2, %v1263_v41  ;;  %v1229_v26 = vpop.f32.mrf.mxu3 }
0x1245   :  { %v1230_v27 = vadd.f32 %v2121_v8, %v1229_v26 }
0x1247   :  { %v1248_v47 = vmax.f32 %v1230_v27, -20.0 }
0x1249   :  { %v1256_v22 = vmin.f32 %v1248_v47, 2.0 }
0x124b   :  { %v1264_v28 = vsel %vm1243_vm1, %v1230_v27, %v1256_v22 }
0x124c   :  { %1273 = vst.msk [vmem:[%s2220_s17 + $0x20] sm:$0xff] %vm1268_vm2, %v1264_v28  ;;  %v1232_v31 = vpop.f32.mrf.mxu3 }
0x124d   :  { %v1233_v33 = vadd.f32 %v2121_v8, %v1232_v31 }
0x124f   :  { %v1249_v34 = vmax.f32 %v1233_v33, -20.0 }
0x1251   :  { %v1257_v36 = vmin.f32 %v1249_v34, 2.0 }
0x1253   :  { %v1265_v37 = vsel %vm1243_vm1, %v1233_v33, %v1257_v36 }
0x1254   :  { %1274 = vst.msk [vmem:[%s2220_s17 + $0x28] sm:$0xff] %vm1268_vm2, %v1265_v37 }
0x1298   :  { %v934_v57 = vpop.permute.xlu0 %933 }
0x1299   :  { %v936_v58 = vmul.f32 %v934_v57, %v928_v35 }
0x129b   :  { %938 = vrot.lane.b32.xlu1 %v936_v58, %s1662_s3 }
0x12a0   :  { %v1154_v59 = vpop.f32.mrf.mxu2 }
0x12a1   :  { %v1155_v60 = vadd.f32 %v2102_v39, %v1154_v59 }
0x12a3   :  { %v1166_v61 = vmax.f32 %v1155_v60, 0.0 }
0x12a5   :  { %1394 = vmatmul.msk.f32.gmra.mxu3 %vm378_vm3, %v1166_v61 }
0x130d   :  { %v939_v62 = vpop.permute.xlu1 %938 }
0x130e   :  { %v941_v63 = vadd.f32 %v939_v62, %v931_v50 }
0x1310   :  { %1475 = vtanh.f32 %v941_v63  ;;  %1280 = vrot.lane.b32.xlu1 %v941_v63, %s1663_s28 }
0x1316   :  { %v1476_v44 = vpop.eup %1475 }
0x1317   :  { %944 = vrot.lane.b32.xlu2 %v1476_v44, %s1664_s29 }
0x1328   :  { %v1235_v1 = vpop.f32.mrf.mxu3 }
0x1329   :  { %v1236_v2 = vadd.f32 %v2121_v8, %v1235_v1 }
0x132b   :  { %v1250_v4 = vmax.f32 %v1236_v2, -20.0 }
0x132d   :  { %v1258_v5 = vmin.f32 %v1250_v4, 2.0 }
0x132f   :  { %v1266_v6 = vsel %vm1243_vm1, %v1236_v2, %v1258_v5 }
0x1330   :  { %1275 = vst.msk [vmem:[%s2220_s17 + $0x30] sm:$0xff] %vm1268_vm2, %v1266_v6 }
0x1371   :  { %v945_v0 = vpop.permute.xlu2 %944 }
0x1372   :  { %v947_v7 = vmul.f32 %v945_v0, %v928_v35 }
0x1374   :  { %957 = vrot.lane.b32.xlu0 %v947_v7, %s1662_s3  ;;  %s1665_s3 = smov [#allocation11]  }
0x1375   :  { %s1291_s28 = sshll.u32 %s1665_s3, 4  ;;  %s1292_s28 = int_to_ptr.vmem [resolvable:$true] %s1291_s28 }
0x1382   :  { %v1281_v29 = vpop.permute.xlu1 %1280 }
0x1383   :  { %1283 = vst.msk [vmem:[#allocation12] sm:$0xff] %vm378_vm3, %v1281_v29 }
0x1384   :  { %1307 = dma.vmem_to_hbm [thread:$0]  %s1303_s20, 128, %s1305_s24, [#allocation13]  }
0x13e6   :  { %v958_v9 = vpop.permute.xlu0 %957 }
0x13e7   :  { %1278 = vst.msk [vmem:[#allocation11] sm:$0xff] %vm378_vm3, %v958_v9  ;;  %1371 = vmatmul.msk.f32.gmra.mxu1 %vm378_vm3, %v958_v9 }
0x13e8   :  { %1296 = dma.vmem_to_hbm [thread:$0]  %s1292_s28, 128, %s1294_s10, [#allocation4]  }
0x1464   :  { %v999_v56 = vpop.f32.mrf.mxu1 }
0x1465   :  { %v1065_v10 = vadd.f32 %v1064_v32, %v999_v56 }
0x1467   :  { %v1078_v51 = vadd.f32 %v2073_v3, %v1065_v10 }
0x1469   :  { %v1086_v11 = vmax.f32 %v1078_v51, 0.0 }
0x146b   :  { %1387 = vmatmul.msk.f32.gmra.mxu2 %vm378_vm3, %v1086_v11 }
0x14ee   :  { %v1157_v12 = vpop.f32.mrf.mxu2 }
0x14ef   :  { %v1158_v13 = vadd.f32 %v2102_v39, %v1157_v12 }
0x14f1   :  { %v1167_v14 = vmax.f32 %v1158_v13, 0.0 }
0x14f3   :  { %1395 = vmatmul.msk.f32.gmra.mxu3 %vm378_vm3, %v1167_v14 }
0x1576   :  { %v1238_v3 = vpop.f32.mrf.mxu3 }
0x1577   :  { %v1239_v39 = vadd.f32 %v2121_v8, %v1238_v3 }
0x1579   :  { %v1251_v15 = vmax.f32 %v1239_v39, -20.0 }
0x157b   :  { %v1259_v25 = vmin.f32 %v1251_v15, 2.0 }
0x157d   :  { %v1267_v16 = vsel %vm1243_vm1, %v1239_v39, %v1259_v25 }
0x157e   :  { %1276 = vst.msk [vmem:[%s2220_s17 + $0x38] sm:$0xff] %vm1268_vm2, %v1267_v16 }
0x157f   :  { %1651 = dma.done.wait [#allocation4], 128  }
0x1580   :  { %1652 = vsyncadd [#allocation4], 4294967168 }
0x1581   :  { %1653 = dma.done.wait [#allocation13], 128  }
0x1582   :  { %1654 = vsyncadd [#allocation13], 4294967168 }
0x1583   :  { %1318 = vsyncpa [#allocation3], 1 }
0x1584   :  { %1319 = vsyncpa [#allocation6], 1 }
0x1585   :  { %1320 = vsyncpa [#allocation9], 1 }
0x1586   :  { %1321 = vsyncpa [#allocation4], 1 }
0x1587   :  { %1322 = vsyncpa [#allocation13], 1 }

</bundles_post_ra>
